<compile_context>
chip_gen: v7x
topology: tpu7x:2x2x1
jax: 0.10.0
libtpu: 0.0.40
codegen_flags: <defaults>
</compile_context>

<pallas_src>
import jax
import jax.numpy as jnp
from jax import lax
from jax.experimental import pallas as pl
from jax.experimental.pallas import tpu as pltpu

EPS = 1e-6


def layernorm_kernel(x_ref, gb_ref, o_ref):
    # x_ref: (rows_block, C); gb_ref: (2, C) -> row 0 = gamma, row 1 = beta
    x = x_ref[...].astype(jnp.float32)
    gb = gb_ref[...].astype(jnp.float32)
    g = gb[0:1, :]
    b = gb[1:2, :]

    # Two-pass (PyTorch-equivalent, numerically robust) mean / variance.
    mean = jnp.mean(x, axis=-1, keepdims=True)
    centered = x - mean
    var = jnp.mean(centered * centered, axis=-1, keepdims=True)

    inv = lax.rsqrt(var + EPS)
    y = centered * inv * g + b
    o_ref[...] = y.astype(o_ref.dtype)


def _sublane_multiple(dtype) -> int:
    itemsize = jnp.dtype(dtype).itemsize
    if itemsize >= 4:
        return 8
    if itemsize == 2:
        return 16
    return 32


def layernorm_pallas(x, gamma, beta, *, row_block=None):
    """LayerNorm over the last axis of an NHWC tensor.

    x: (N, H, W, C); gamma, beta: (C,)
    row_block: rows per grid step.  Default (None) uses rows//2 rounded to the
      dtype's sublane multiple — a 2-step 'parallel' grid that feeds both v7x
      TensorCores and overlaps in/out DMA on v5e/v6e.  Pass `rows` to force a
      single full-tensor block, or a smaller value for deeper pipelining.
    """
    N, H, W, C = x.shape
    rows = N * H * W
    x2d = x.reshape(rows, C)
    gb = jnp.stack([gamma, beta], axis=0)  # (2, C); hoist out if static per layer

    mult = _sublane_multiple(x.dtype)
    if row_block is None:
        row_block = rows // 2  # 2-step parallel grid by default
    rb = max(mult, (row_block // mult) * mult)
    rb = min(rb, rows)

    grid = (pl.cdiv(rows, rb),)

    itemsize = jnp.dtype(x.dtype).itemsize
    cost = pl.CostEstimate(
        flops=rows * C * 8,
        transcendentals=rows,                       # one rsqrt per row
        bytes_accessed=2 * rows * C * itemsize + 2 * C * 4,
    )

    out2d = pl.pallas_call(
        layernorm_kernel,
        out_shape=jax.ShapeDtypeStruct((rows, C), x.dtype),
        grid_spec=pltpu.PrefetchScalarGridSpec(
            num_scalar_prefetch=0,
            grid=grid,
            in_specs=[
                pl.BlockSpec((rb, C), lambda i: (i, 0)),
                pl.BlockSpec((2, C), lambda i: (0, 0)),
            ],
            out_specs=pl.BlockSpec((rb, C), lambda i: (i, 0)),
        ),
        compiler_params=pltpu.CompilerParams(
            dimension_semantics=("parallel",),
        ),
        cost_estimate=cost,
    )(x2d, gb)

    return out2d.reshape(N, H, W, C)


if __name__ == "__main__":
    key = jax.random.PRNGKey(0)
    kx, kg, kb = jax.random.split(key, 3)

    # Input matching the module: torch.randn([1, 28, 28, 192])
    x = jax.random.normal(kx, (1, 28, 28, 192), dtype=jnp.float32)

    # LayerNorm((192,)) parameters; perturb from the default (1, 0) so the
    # affine path is exercised, deterministically.
    gamma = 1.0 + 0.02 * jax.random.normal(kg, (192,), dtype=jnp.float32)
    beta = 0.02 * jax.random.normal(kb, (192,), dtype=jnp.float32)

    out = layernorm_pallas(x, gamma, beta)
    out = jax.block_until_ready(out)

    # Reference (plain JAX) for a sanity check of the kernel semantics.
    mean = jnp.mean(x, axis=-1, keepdims=True)
    var = jnp.mean((x - mean) ** 2, axis=-1, keepdims=True)
    ref = (x - mean) * lax.rsqrt(var + EPS) * gamma + beta

    assert out.shape == (1, 28, 28, 192)
    assert jnp.allclose(out, ref, atol=1e-5, rtol=1e-5), "mismatch vs reference"

    print("KERNEL_OK")
</pallas_src>

<mosaic_0001>
module attributes {stable_mosaic.version = 11 : i64} {
  func.func @layernorm_kernel(%arg0: i32, %arg1: memref<392x192xf32, #tpu.memory_space<vmem>>, %arg2: memref<2x192xf32, #tpu.memory_space<vmem>>, %arg3: memref<392x192xf32, #tpu.memory_space<vmem>>) attributes {dimension_semantics = [#tpu.dimension_semantics<parallel>], iteration_bounds = array<i64: 2>, scalar_prefetch = 0 : i64, scratch_operands = 0 : i64, tpu.core_type = #tpu.core_type<tc>, window_params = [{transform_indices = @transform_0, window_bounds = array<i64: 392, 192>}, {pipeline_mode = #tpu.pipeline_mode<synchronous>, transform_indices = @transform_1, window_bounds = array<i64: 2, 192>}, {transform_indices = @transform_2, window_bounds = array<i64: 392, 192>}]} {
    %c0 = arith.constant 0 : index
    %c0_0 = arith.constant 0 : index
    %0 = vector.load %arg1[%c0, %c0_0] : memref<392x192xf32, #tpu.memory_space<vmem>>, vector<392x192xf32>
    %c0_1 = arith.constant 0 : index
    %c0_2 = arith.constant 0 : index
    %1 = vector.load %arg2[%c0_1, %c0_2] : memref<2x192xf32, #tpu.memory_space<vmem>>, vector<2x192xf32>
    %2 = vector.extract_strided_slice %1 {offsets = [0, 0], sizes = [1, 192], strides = [1, 1]} : vector<2x192xf32> to vector<1x192xf32>
    %3 = vector.extract_strided_slice %1 {offsets = [1, 0], sizes = [1, 192], strides = [1, 1]} : vector<2x192xf32> to vector<1x192xf32>
    %cst = arith.constant dense<0.000000e+00> : vector<392xf32>
    %4 = vector.multi_reduction <add>, %0, %cst [1] : vector<392x192xf32> to vector<392xf32>
    %5 = vector.shape_cast %4 : vector<392xf32> to vector<392x1xf32>
    %cst_3 = arith.constant 1.920000e+02 : f32
    %6 = vector.broadcast %cst_3 : f32 to vector<392x1xf32>
    %7 = arith.divf %5, %6 : vector<392x1xf32>
    %8 = vector.broadcast %7 : vector<392x1xf32> to vector<392x192xf32>
    %9 = arith.subf %0, %8 : vector<392x192xf32>
    %10 = arith.mulf %9, %9 : vector<392x192xf32>
    %cst_4 = arith.constant dense<0.000000e+00> : vector<392xf32>
    %11 = vector.multi_reduction <add>, %10, %cst_4 [1] : vector<392x192xf32> to vector<392xf32>
    %12 = vector.shape_cast %11 : vector<392xf32> to vector<392x1xf32>
    %cst_5 = arith.constant 1.920000e+02 : f32
    %13 = vector.broadcast %cst_5 : f32 to vector<392x1xf32>
    %14 = arith.divf %12, %13 : vector<392x1xf32>
    %cst_6 = arith.constant 9.99999997E-7 : f32
    %15 = vector.broadcast %cst_6 : f32 to vector<392x1xf32>
    %16 = arith.addf %14, %15 : vector<392x1xf32>
    %17 = math.rsqrt %16 : vector<392x1xf32>
    %18 = vector.broadcast %17 : vector<392x1xf32> to vector<392x192xf32>
    %19 = arith.mulf %9, %18 : vector<392x192xf32>
    %20 = vector.broadcast %2 : vector<1x192xf32> to vector<392x192xf32>
    %21 = arith.mulf %19, %20 : vector<392x192xf32>
    %22 = vector.broadcast %3 : vector<1x192xf32> to vector<392x192xf32>
    %23 = arith.addf %21, %22 : vector<392x192xf32>
    %c0_7 = arith.constant 0 : index
    %c0_8 = arith.constant 0 : index
    %24 = vector.load %arg3[%c0_7, %c0_8] : memref<392x192xf32, #tpu.memory_space<vmem>>, vector<392x192xf32>
    tpu.vector_store %arg3[%c0_7, %c0_8], %23 {strides = array<i32>} : memref<392x192xf32, #tpu.memory_space<vmem>>, vector<392x192xf32>,
    return
  }
  func.func @transform_0(%arg0: i32) -> (i32, i32) {
    %c0_i32 = arith.constant 0 : i32
    %c0_i32_0 = arith.constant 0 : i32
    return %arg0, %c0_i32 : i32, i32
  }
  func.func @transform_1(%arg0: i32) -> (i32, i32) {
    %c0_i32 = arith.constant 0 : i32
    %c0_i32_0 = arith.constant 0 : i32
    %c0_i32_1 = arith.constant 0 : i32
    return %c0_i32, %c0_i32_0 : i32, i32
  }
  func.func @transform_2(%arg0: i32) -> (i32, i32) {
    %c0_i32 = arith.constant 0 : i32
    %c0_i32_0 = arith.constant 0 : i32
    return %arg0, %c0_i32 : i32, i32
  }
}

</mosaic_0001>

<bundles_post_ra>
// kernel: tpu_custom_call.1
= control target key start
LH: loop header
LB: loop body
LE: loop exit
PB: predicated region body
PF: predicated region fallthrough
CT: control target
= control target key end

     0   :  { %s1666_s9 = smov 0   ;;  %s3162_s0 = inlined_call_operand.vmem [shape: f32[784,192], index: 0, kind: input, shape index: {}]   ;;  %s3163_s1 = inlined_call_operand.vmem [shape: f32[2,192], index: 1, kind: input, shape index: {}]   ;;  %s3164_s2 = inlined_call_operand.vmem [shape: f32[784,192], index: 2, kind: output, shape index: {}]  }
   0x1 LB: > { %s1524_s10 = sadd.s32 4294967295, %s1649_s9   ;;  %p1528_p0 = scmp.ge.s32.totalorder %s1649_s9, 1  ;;  %s1649_s9 = sphi %s1666_s9, %s12_s9  }
   0x2   : > { %p114_p1 = scmp.lt.s32.totalorder %s1649_s9, 3 }
   0x4   : > { %p115_p2 = pnand %p1528_p0, %p114_p1 }
   0x6   : > { %118 = sbr.rel (%p115_p2) target bundleno = 448 (0x1c0), region = 28 }
   0xd   : > { %s138_s11 = smul.u32 49, %s1524_s10  ;;  %vm251_vm0 = vcmask 523264  }
   0xf   : > { %p139_p3 = scmp.lt.s32.totalorder %s138_s11, 97 }
  0x11   : > { %s3475_s11 = smov (!%p139_p3, %s138_s11), 97 }
  0x12   : > { %s1535_s12 = sshll.u32 %s3475_s11, 4 }
  0x13   : > { %s1682_s15 = scalar_lea.vmem %s3162_s0, %s1535_s12  ;;  %s2684_s20 = scalar_lea.vmem %s3164_s2, %s1535_s12 }
  0x14   : > { %v1685_v0 = vld [vmem:[%s1682_s15] sm:$0xff]  ;;  %v1688_v1 = vld [vmem:[%s1682_s15 + $0x8] sm:$0xff]  ;;  %v1699_v5 = vld [vmem:[%s1682_s15 + $0x10] sm:$0xff] }
  0x15   : > { %v1691_v2 = vld [vmem:[%s1682_s15 + $0x20] sm:$0xff]  ;;  %v252_v3 = vsel %vm251_vm0, %v1688_v1, 0.0  ;;  %v1696_v4 = vld [vmem:[%s1682_s15 + $0x28] sm:$0xff]  ;;  %v1702_v6 = vld [vmem:[%s1682_s15 + $0x18] sm:$0xff] }
  0x16   : > { %v253_v7 = vadd.f32 %v252_v3, %v1685_v0  ;;  %v260_v8 = vsel %vm251_vm0, %v1696_v4, 0.0  ;;  %v256_v9 = vsel %vm251_vm0, %v1702_v6, 0.0  ;;  %v1710_v10 = vld [vmem:[%s1682_s15 + $0x30] sm:$0xff]  ;;  %v1713_v11 = vld [vmem:[%s1682_s15 + $0x38] sm:$0xff]  ;;  %v1719_v14 = vld [vmem:[%s1682_s15 + $0x48] sm:$0xff] }
  0x17   : > { %v261_v12 = vadd.f32 %v260_v8, %v1691_v2  ;;  %v264_v13 = vsel %vm251_vm0, %v1713_v11, 0.0  ;;  %v1722_v15 = vld [vmem:[%s1682_s15 + $0x58] sm:$0xff]  ;;  %v257_v16 = vadd.f32 %v256_v9, %v1699_v5  ;;  %v1727_v18 = vld [vmem:[%s1682_s15 + $0x40] sm:$0xff]  ;;  %v268_v19 = vsel %vm251_vm0, %v1719_v14, 0.0  ;;  %v1732_v20 = vld [vmem:[%s1682_s15 + $0x50] sm:$0xff] }
  0x18   : > { %254 = vadd.xlane.f32.xlu0 %v253_v7  ;;  %v265_v17 = vadd.f32 %v264_v13, %v1710_v10  ;;  %v272_v21 = vsel %vm251_vm0, %v1722_v15, 0.0  ;;  %v1737_v22 = vld [vmem:[%s1682_s15 + $0x68] sm:$0xff]  ;;  %v1740_v23 = vld [vmem:[%s1682_s15 + $0x78] sm:$0xff]  ;;  %v269_v24 = vadd.f32 %v268_v19, %v1727_v18  ;;  %v1745_v26 = vld [vmem:[%s1682_s15 + $0x60] sm:$0xff] }
  0x19   : > { %262 = vadd.xlane.f32.xlu1 %v261_v12  ;;  %v273_v25 = vadd.f32 %v272_v21, %v1732_v20  ;;  %v276_v27 = vsel %vm251_vm0, %v1737_v22, 0.0  ;;  %v1750_v28 = vld [vmem:[%s1682_s15 + $0x70] sm:$0xff]  ;;  %v280_v29 = vsel %vm251_vm0, %v1740_v23, 0.0  ;;  %v1755_v30 = vld [vmem:[%s1682_s15 + $0x88] sm:$0xff]  ;;  %v1758_v31 = vld [vmem:[%s1682_s15 + $0x98] sm:$0xff] }
  0x1a   : > { %v277_v32 = vadd.f32 %v276_v27, %v1745_v26  ;;  %v281_v33 = vadd.f32 %v280_v29, %v1750_v28  ;;  %v1763_v34 = vld [vmem:[%s1682_s15 + $0x80] sm:$0xff]  ;;  %v284_v35 = vsel %vm251_vm0, %v1755_v30, 0.0  ;;  %v1768_v36 = vld [vmem:[%s1682_s15 + $0x90] sm:$0xff]  ;;  %v288_v37 = vsel %vm251_vm0, %v1758_v31, 0.0  ;;  %v1773_v38 = vld [vmem:[%s1682_s15 + $0xa8] sm:$0xff] }
  0x1b   : > { %v1776_v39 = vld [vmem:[%s1682_s15 + $0xb8] sm:$0xff]  ;;  %v285_v40 = vadd.f32 %v284_v35, %v1763_v34  ;;  %v289_v41 = vadd.f32 %v288_v37, %v1768_v36  ;;  %v1781_v42 = vld [vmem:[%s1682_s15 + $0xa0] sm:$0xff]  ;;  %v292_v43 = vsel %vm251_vm0, %v1773_v38, 0.0  ;;  %v1786_v44 = vld [vmem:[%s1682_s15 + $0xb0] sm:$0xff] }
  0x1c   : > { %258 = vadd.xlane.f32.xlu0 %v257_v16  ;;  %v296_v45 = vsel %vm251_vm0, %v1776_v39, 0.0  ;;  %v1791_v46 = vld [vmem:[%s1682_s15 + $0xc8] sm:$0xff]  ;;  %v1794_v47 = vld [vmem:[%s1682_s15 + $0xd8] sm:$0xff]  ;;  %v293_v48 = vadd.f32 %v292_v43, %v1781_v42  ;;  %v1799_v50 = vld [vmem:[%s1682_s15 + $0xc0] sm:$0xff] }
  0x1d   : > { %266 = vadd.xlane.f32.xlu1 %v265_v17  ;;  %v297_v49 = vadd.f32 %v296_v45, %v1786_v44  ;;  %v300_v51 = vsel %vm251_vm0, %v1791_v46, 0.0  ;;  %v1804_v52 = vld [vmem:[%s1682_s15 + $0xd0] sm:$0xff]  ;;  %v304_v53 = vsel %vm251_vm0, %v1794_v47, 0.0  ;;  %v1809_v54 = vld [vmem:[%s1682_s15 + $0xe8] sm:$0xff]  ;;  %v1812_v55 = vld [vmem:[%s1682_s15 + $0xf8] sm:$0xff] }
  0x1e   : > { %v301_v56 = vadd.f32 %v300_v51, %v1799_v50  ;;  %v305_v57 = vadd.f32 %v304_v53, %v1804_v52  ;;  %v1817_v58 = vld [vmem:[%s1682_s15 + $0xe0] sm:$0xff]  ;;  %v308_v59 = vsel %vm251_vm0, %v1809_v54, 0.0  ;;  %v1822_v60 = vld [vmem:[%s1682_s15 + $0xf0] sm:$0xff]  ;;  %v312_v61 = vsel %vm251_vm0, %v1812_v55, 0.0  ;;  %v1827_v62 = vld [vmem:[%s1682_s15 + $0x108] sm:$0xff] }
  0x1f   : > { %v1830_v63 = vld [vmem:[%s1682_s15 + $0x118] sm:$0xff]  ;;  %v309_v3 = vadd.f32 %v308_v59, %v1817_v58  ;;  %v313_v7 = vadd.f32 %v312_v61, %v1822_v60  ;;  %v1835_v8 = vld [vmem:[%s1682_s15 + $0x100] sm:$0xff]  ;;  %v316_v9 = vsel %vm251_vm0, %v1827_v62, 0.0  ;;  %v1840_v12 = vld [vmem:[%s1682_s15 + $0x110] sm:$0xff] }
  0x20   : > { %270 = vadd.xlane.f32.xlu0 %v269_v24  ;;  %v320_v13 = vsel %vm251_vm0, %v1830_v63, 0.0  ;;  %v1845_v16 = vld [vmem:[%s1682_s15 + $0x128] sm:$0xff]  ;;  %v1848_v17 = vld [vmem:[%s1682_s15 + $0x138] sm:$0xff]  ;;  %v317_v19 = vadd.f32 %v316_v9, %v1835_v8  ;;  %v1853_v24 = vld [vmem:[%s1682_s15 + $0x120] sm:$0xff] }
  0x21   : > { %274 = vadd.xlane.f32.xlu1 %v273_v25  ;;  %v321_v21 = vadd.f32 %v320_v13, %v1840_v12  ;;  %v324_v25 = vsel %vm251_vm0, %v1845_v16, 0.0  ;;  %v1858_v27 = vld [vmem:[%s1682_s15 + $0x130] sm:$0xff]  ;;  %v328_v29 = vsel %vm251_vm0, %v1848_v17, 0.0 }
  0x22   : > { %v325_v35 = vadd.f32 %v324_v25, %v1853_v24  ;;  %v329_v37 = vadd.f32 %v328_v29, %v1858_v27  ;;  %v1876_v43 = vld [vmem:[%s1682_s15 + $0x150] sm:$0xff] }
  0x23   : > { %v1894_v59 = vld [vmem:[%s1682_s15 + $0x170] sm:$0xff] }
  0x24   : > { %278 = vadd.xlane.f32.xlu0 %v277_v32  ;;  %v1863_v32 = vld [vmem:[%s1682_s15 + $0x148] sm:$0xff]  ;;  %v1912_v25 = vld [vmem:[%s1682_s15 + $0x190] sm:$0xff] }
  0x25   : > { %282 = vadd.xlane.f32.xlu1 %v281_v33  ;;  %v1866_v33 = vld [vmem:[%s1682_s15 + $0x158] sm:$0xff]  ;;  %3271 = vst [vmem:[#allocation5_spill] sm:$0xff] %v1912_v25 }
  0x26   : > { %v336_v45 = vsel %vm251_vm0, %v1866_v33, 0.0 }
  0x27   : > { %v337_v53 = vadd.f32 %v336_v45, %v1876_v43 }
  0x28   : > { %286 = vadd.xlane.f32.xlu0 %v285_v40  ;;  %v1871_v40 = vld [vmem:[%s1682_s15 + $0x140] sm:$0xff] }
  0x29   : > { %290 = vadd.xlane.f32.xlu1 %v289_v41  ;;  %v332_v41 = vsel %vm251_vm0, %v1863_v32, 0.0 }
  0x2a   : > { %v333_v51 = vadd.f32 %v332_v41, %v1871_v40 }
  0x2c   : > { %294 = vadd.xlane.f32.xlu0 %v293_v48  ;;  %v1881_v48 = vld [vmem:[%s1682_s15 + $0x168] sm:$0xff] }
  0x2d   : > { %298 = vadd.xlane.f32.xlu1 %v297_v49  ;;  %v1884_v49 = vld [vmem:[%s1682_s15 + $0x178] sm:$0xff] }
  0x2e   : > { %v344_v61 = vsel %vm251_vm0, %v1884_v49, 0.0 }
  0x2f   : > { %v345_v13 = vadd.f32 %v344_v61, %v1894_v59 }
  0x30   : > { %302 = vadd.xlane.f32.xlu0 %v301_v56  ;;  %v1889_v56 = vld [vmem:[%s1682_s15 + $0x160] sm:$0xff] }
  0x31   : > { %306 = vadd.xlane.f32.xlu1 %v305_v57  ;;  %v340_v57 = vsel %vm251_vm0, %v1881_v48, 0.0 }
  0x32   : > { %v341_v9 = vadd.f32 %v340_v57, %v1889_v56  ;;  %v1930_v57 = vld [vmem:[%s1682_s15 + $0x1b0] sm:$0xff] }
  0x33   : > { %3275 = vst [vmem:[#allocation9_spill] sm:$0xff] %v1930_v57 }
  0x34   : > { %310 = vadd.xlane.f32.xlu0 %v309_v3  ;;  %v1899_v3 = vld [vmem:[%s1682_s15 + $0x188] sm:$0xff] }
  0x35   : > { %314 = vadd.xlane.f32.xlu1 %v313_v7  ;;  %3268 = vst [vmem:[#allocation2_spill] sm:$0xff] %v1899_v3  ;;  %v1902_v7 = vld [vmem:[%s1682_s15 + $0x198] sm:$0xff] }
  0x36   : > { %3269 = vst [vmem:[#allocation3_spill] sm:$0xff] %v1902_v7  ;;  %v352_v29 = vsel %vm251_vm0, %v1902_v7, 0.0  ;;  %v1935_v7 = vld [vmem:[%s1682_s15 + $0x1c8] sm:$0xff] }
  0x37   : > { %v353_v45 = vadd.f32 %v352_v29, %v1912_v25  ;;  %3276 = vst [vmem:[#allocation10_spill] sm:$0xff] %v1935_v7  ;;  %v1943_v29 = vld [vmem:[%s1682_s15 + $0x1c0] sm:$0xff] }
  0x38   : > { %318 = vadd.xlane.f32.xlu0 %v317_v19  ;;  %v1907_v19 = vld [vmem:[%s1682_s15 + $0x180] sm:$0xff]  ;;  %3278 = vst [vmem:[#allocation12_spill] sm:$0xff] %v1943_v29 }
  0x39   : > { %322 = vadd.xlane.f32.xlu1 %v321_v21  ;;  %3270 = vst [vmem:[#allocation4_spill] sm:$0xff] %v1907_v19  ;;  %v348_v21 = vsel %vm251_vm0, %v1899_v3, 0.0  ;;  %v1953_v3 = vld [vmem:[%s1682_s15 + $0x1e8] sm:$0xff] }
  0x3a   : > { %v349_v41 = vadd.f32 %v348_v21, %v1907_v19  ;;  %3280 = vst [vmem:[#allocation14_spill] sm:$0xff] %v1953_v3 }
  0x3c   : > { %326 = vadd.xlane.f32.xlu0 %v325_v35  ;;  %v1917_v35 = vld [vmem:[%s1682_s15 + $0x1a8] sm:$0xff] }
  0x3d   : > { %330 = vadd.xlane.f32.xlu1 %v329_v37  ;;  %3272 = vst [vmem:[#allocation6_spill] sm:$0xff] %v1917_v35  ;;  %v1920_v37 = vld [vmem:[%s1682_s15 + $0x1b8] sm:$0xff] }
  0x3e   : > { %3273 = vst [vmem:[#allocation7_spill] sm:$0xff] %v1920_v37  ;;  %v360_v61 = vsel %vm251_vm0, %v1920_v37, 0.0  ;;  %v1948_v37 = vld [vmem:[%s1682_s15 + $0x1d0] sm:$0xff] }
  0x3f   : > { %v361_v21 = vadd.f32 %v360_v61, %v1930_v57  ;;  %3279 = vst [vmem:[#allocation13_spill] sm:$0xff] %v1948_v37  ;;  %v1961_v61 = vld [vmem:[%s1682_s15 + $0x1e0] sm:$0xff] }
  0x40   : > { %334 = vadd.xlane.f32.xlu0 %v333_v51  ;;  %v1925_v51 = vld [vmem:[%s1682_s15 + $0x1a0] sm:$0xff]  ;;  %3282 = vst [vmem:[#allocation16_spill] sm:$0xff] %v1961_v61 }
  0x41   : > { %338 = vadd.xlane.f32.xlu1 %v337_v53  ;;  %3274 = vst [vmem:[#allocation8_spill] sm:$0xff] %v1925_v51  ;;  %v356_v53 = vsel %vm251_vm0, %v1917_v35, 0.0  ;;  %v364_v35 = vsel %vm251_vm0, %v1935_v7, 0.0  ;;  %v372_v7 = vsel %vm251_vm0, %v1953_v3, 0.0 }
  0x44   : > { %342 = vadd.xlane.f32.xlu0 %v341_v9  ;;  %v1938_v9 = vld [vmem:[%s1682_s15 + $0x1d8] sm:$0xff] }
  0x45   : > { %346 = vadd.xlane.f32.xlu1 %v345_v13  ;;  %3277 = vst [vmem:[#allocation11_spill] sm:$0xff] %v1938_v9  ;;  %v357_v13 = vadd.f32 %v356_v53, %v1925_v51  ;;  %v368_v25 = vsel %vm251_vm0, %v1938_v9, 0.0  ;;  %v1966_v9 = vld [vmem:[%s1682_s15 + $0x1f0] sm:$0xff]  ;;  %v1971_v51 = vld [vmem:[%s1682_s15 + $0x208] sm:$0xff] }
  0x46   : > { %v369_v53 = vadd.f32 %v368_v25, %v1948_v37  ;;  %3283 = vst [vmem:[#allocation17_spill] sm:$0xff] %v1966_v9  ;;  %3284 = vst [vmem:[#allocation18_spill] sm:$0xff] %v1971_v51  ;;  %v373_v25 = vadd.f32 %v372_v7, %v1961_v61  ;;  %v380_v3 = vsel %vm251_vm0, %v1971_v51, 0.0  ;;  %v2007_v61 = vld [vmem:[%s1682_s15 + $0x248] sm:$0xff] }
  0x47   : > { %3292 = vst [vmem:[#allocation26_spill] sm:$0xff] %v2007_v61 }
  0x48   : > { %350 = vadd.xlane.f32.xlu0 %v349_v41  ;;  %v1956_v41 = vld [vmem:[%s1682_s15 + $0x1f8] sm:$0xff] }
  0x49   : > { %354 = vadd.xlane.f32.xlu1 %v353_v45  ;;  %3281 = vst [vmem:[#allocation15_spill] sm:$0xff] %v1956_v41  ;;  %v365_v45 = vadd.f32 %v364_v35, %v1943_v29  ;;  %v376_v57 = vsel %vm251_vm0, %v1956_v41, 0.0  ;;  %v1984_v41 = vld [vmem:[%s1682_s15 + $0x210] sm:$0xff]  ;;  %v1989_v29 = vld [vmem:[%s1682_s15 + $0x228] sm:$0xff] }
  0x4a   : > { %v377_v35 = vadd.f32 %v376_v57, %v1966_v9  ;;  %3287 = vst [vmem:[#allocation21_spill] sm:$0xff] %v1984_v41  ;;  %3288 = vst [vmem:[#allocation22_spill] sm:$0xff] %v1989_v29  ;;  %v388_v51 = vsel %vm251_vm0, %v1989_v29, 0.0  ;;  %v396_v29 = vsel %vm251_vm0, %v2007_v61, 0.0 }
  0x4c   : > { %358 = vadd.xlane.f32.xlu0 %v357_v13  ;;  %v1974_v13 = vld [vmem:[%s1682_s15 + $0x218] sm:$0xff] }
  0x4d   : > { %362 = vadd.xlane.f32.xlu1 %v361_v21  ;;  %3285 = vst [vmem:[#allocation19_spill] sm:$0xff] %v1974_v13  ;;  %v1979_v21 = vld [vmem:[%s1682_s15 + $0x200] sm:$0xff]  ;;  %v384_v37 = vsel %vm251_vm0, %v1974_v13, 0.0  ;;  %v2002_v13 = vld [vmem:[%s1682_s15 + $0x230] sm:$0xff] }
  0x4e   : > { %3286 = vst [vmem:[#allocation20_spill] sm:$0xff] %v1979_v21  ;;  %v381_v7 = vadd.f32 %v380_v3, %v1979_v21  ;;  %v385_v57 = vadd.f32 %v384_v37, %v1984_v41  ;;  %3291 = vst [vmem:[#allocation25_spill] sm:$0xff] %v2002_v13  ;;  %v2025_v21 = vld [vmem:[%s1682_s15 + $0x268] sm:$0xff] }
  0x4f   : > { %3296 = vst [vmem:[#allocation30_spill] sm:$0xff] %v2025_v21  ;;  %v404_v61 = vsel %vm251_vm0, %v2025_v21, 0.0 }
  0x50   : > { %366 = vadd.xlane.f32.xlu0 %v365_v45  ;;  %v1992_v45 = vld [vmem:[%s1682_s15 + $0x238] sm:$0xff] }
  0x51   : > { %370 = vadd.xlane.f32.xlu1 %v369_v53  ;;  %3289 = vst [vmem:[#allocation23_spill] sm:$0xff] %v1992_v45  ;;  %v1997_v53 = vld [vmem:[%s1682_s15 + $0x220] sm:$0xff]  ;;  %v392_v9 = vsel %vm251_vm0, %v1992_v45, 0.0  ;;  %v2020_v45 = vld [vmem:[%s1682_s15 + $0x250] sm:$0xff] }
  0x52   : > { %3290 = vst [vmem:[#allocation24_spill] sm:$0xff] %v1997_v53  ;;  %v389_v3 = vadd.f32 %v388_v51, %v1997_v53  ;;  %v393_v37 = vadd.f32 %v392_v9, %v2002_v13  ;;  %3295 = vst [vmem:[#allocation29_spill] sm:$0xff] %v2020_v45  ;;  %v2043_v53 = vld [vmem:[%s1682_s15 + $0x288] sm:$0xff] }
  0x53   : > { %3300 = vst [vmem:[#allocation34_spill] sm:$0xff] %v2043_v53  ;;  %v412_v21 = vsel %vm251_vm0, %v2043_v53, 0.0 }
  0x54   : > { %374 = vadd.xlane.f32.xlu0 %v373_v25  ;;  %v2010_v25 = vld [vmem:[%s1682_s15 + $0x258] sm:$0xff] }
  0x55   : > { %378 = vadd.xlane.f32.xlu1 %v377_v35  ;;  %3293 = vst [vmem:[#allocation27_spill] sm:$0xff] %v2010_v25  ;;  %v2015_v35 = vld [vmem:[%s1682_s15 + $0x240] sm:$0xff]  ;;  %v400_v41 = vsel %vm251_vm0, %v2010_v25, 0.0  ;;  %v2038_v25 = vld [vmem:[%s1682_s15 + $0x270] sm:$0xff] }
  0x56   : > { %3294 = vst [vmem:[#allocation28_spill] sm:$0xff] %v2015_v35  ;;  %v397_v51 = vadd.f32 %v396_v29, %v2015_v35  ;;  %v401_v9 = vadd.f32 %v400_v41, %v2020_v45  ;;  %3299 = vst [vmem:[#allocation33_spill] sm:$0xff] %v2038_v25  ;;  %v2061_v35 = vld [vmem:[%s1682_s15 + $0x2a8] sm:$0xff] }
  0x57   : > { %3304 = vst [vmem:[#allocation38_spill] sm:$0xff] %v2061_v35  ;;  %v420_v53 = vsel %vm251_vm0, %v2061_v35, 0.0 }
  0x58   : > { %382 = vadd.xlane.f32.xlu0 %v381_v7  ;;  %v2028_v7 = vld [vmem:[%s1682_s15 + $0x278] sm:$0xff] }
  0x59   : > { %386 = vadd.xlane.f32.xlu1 %v385_v57  ;;  %3297 = vst [vmem:[#allocation31_spill] sm:$0xff] %v2028_v7  ;;  %v2033_v57 = vld [vmem:[%s1682_s15 + $0x260] sm:$0xff]  ;;  %v408_v13 = vsel %vm251_vm0, %v2028_v7, 0.0  ;;  %v2056_v7 = vld [vmem:[%s1682_s15 + $0x290] sm:$0xff] }
  0x5a   : > { %3298 = vst [vmem:[#allocation32_spill] sm:$0xff] %v2033_v57  ;;  %v405_v29 = vadd.f32 %v404_v61, %v2033_v57  ;;  %v409_v41 = vadd.f32 %v408_v13, %v2038_v25  ;;  %3303 = vst [vmem:[#allocation37_spill] sm:$0xff] %v2056_v7  ;;  %v2079_v57 = vld [vmem:[%s1682_s15 + $0x2c8] sm:$0xff] }
  0x5b   : > { %3308 = vst [vmem:[#allocation42_spill] sm:$0xff] %v2079_v57  ;;  %v428_v35 = vsel %vm251_vm0, %v2079_v57, 0.0 }
  0x5c   : > { %390 = vadd.xlane.f32.xlu0 %v389_v3  ;;  %v2046_v3 = vld [vmem:[%s1682_s15 + $0x298] sm:$0xff] }
  0x5d   : > { %394 = vadd.xlane.f32.xlu1 %v393_v37  ;;  %3301 = vst [vmem:[#allocation35_spill] sm:$0xff] %v2046_v3  ;;  %v2051_v37 = vld [vmem:[%s1682_s15 + $0x280] sm:$0xff]  ;;  %v416_v45 = vsel %vm251_vm0, %v2046_v3, 0.0  ;;  %v2074_v3 = vld [vmem:[%s1682_s15 + $0x2b0] sm:$0xff] }
  0x5e   : > { %3302 = vst [vmem:[#allocation36_spill] sm:$0xff] %v2051_v37  ;;  %v413_v61 = vadd.f32 %v412_v21, %v2051_v37  ;;  %v417_v13 = vadd.f32 %v416_v45, %v2056_v7  ;;  %3307 = vst [vmem:[#allocation41_spill] sm:$0xff] %v2074_v3  ;;  %v2092_v7 = vld [vmem:[%s1682_s15 + $0x2d0] sm:$0xff]  ;;  %v2097_v37 = vld [vmem:[%s1682_s15 + $0x2e8] sm:$0xff] }
  0x5f   : > { %3311 = vst [vmem:[#allocation45_spill] sm:$0xff] %v2092_v7  ;;  %3312 = vst [vmem:[#allocation46_spill] sm:$0xff] %v2097_v37  ;;  %v436_v57 = vsel %vm251_vm0, %v2097_v37, 0.0 }
  0x60   : > { %398 = vadd.xlane.f32.xlu0 %v397_v51  ;;  %v2064_v51 = vld [vmem:[%s1682_s15 + $0x2b8] sm:$0xff] }
  0x61   : > { %402 = vadd.xlane.f32.xlu1 %v401_v9  ;;  %3305 = vst [vmem:[#allocation39_spill] sm:$0xff] %v2064_v51  ;;  %v2069_v9 = vld [vmem:[%s1682_s15 + $0x2a0] sm:$0xff]  ;;  %v424_v25 = vsel %vm251_vm0, %v2064_v51, 0.0 }
  0x62   : > { %3306 = vst [vmem:[#allocation40_spill] sm:$0xff] %v2069_v9  ;;  %v421_v21 = vadd.f32 %v420_v53, %v2069_v9  ;;  %v425_v45 = vadd.f32 %v424_v25, %v2074_v3  ;;  %v2110_v3 = vld [vmem:[%s1682_s15 + $0x2f0] sm:$0xff]  ;;  %v2115_v9 = vld [vmem:[%s1682_s15 + $0x308] sm:$0xff] }
  0x64   : > { %406 = vadd.xlane.f32.xlu0 %v405_v29  ;;  %v2082_v29 = vld [vmem:[%s1682_s15 + $0x2d8] sm:$0xff] }
  0x65   : > { %410 = vadd.xlane.f32.xlu1 %v409_v41  ;;  %3309 = vst [vmem:[#allocation43_spill] sm:$0xff] %v2082_v29  ;;  %v2087_v41 = vld [vmem:[%s1682_s15 + $0x2c0] sm:$0xff]  ;;  %v432_v51 = vsel %vm251_vm0, %v2082_v29, 0.0 }
  0x66   : > { %3310 = vst [vmem:[#allocation44_spill] sm:$0xff] %v2087_v41  ;;  %v429_v53 = vadd.f32 %v428_v35, %v2087_v41  ;;  %v433_v25 = vadd.f32 %v432_v51, %v2092_v7  ;;  %v444_v51 = vsel %vm251_vm0, %v2115_v9, 0.0 }
  0x68   : > { %414 = vadd.xlane.f32.xlu0 %v413_v61  ;;  %v2100_v61 = vld [vmem:[%s1682_s15 + $0x2f8] sm:$0xff] }
  0x69   : > { %418 = vadd.xlane.f32.xlu1 %v417_v13  ;;  %3313 = vst [vmem:[#allocation47_spill] sm:$0xff] %v2100_v61  ;;  %v2105_v13 = vld [vmem:[%s1682_s15 + $0x2e0] sm:$0xff]  ;;  %v440_v29 = vsel %vm251_vm0, %v2100_v61, 0.0 }
  0x6a   : > { %v441_v35 = vadd.f32 %v440_v29, %v2110_v3 }
  0x6c   : > { %422 = vadd.xlane.f32.xlu0 %v421_v21  ;;  %v437_v21 = vadd.f32 %v436_v57, %v2105_v13 }
  0x6d   : > { %426 = vadd.xlane.f32.xlu1 %v425_v45  ;;  %v2120_v45 = vld [vmem:[%s1682_s15 + $0x300] sm:$0xff] }
  0x6e   : > { %v445_v37 = vadd.f32 %v444_v51, %v2120_v45 }
  0x70   : > { %430 = vadd.xlane.f32.xlu0 %v429_v53 }
  0x71   : > { %434 = vadd.xlane.f32.xlu1 %v433_v25 }
  0x74   : > { %438 = vadd.xlane.f32.xlu0 %v437_v21 }
  0x75   : > { %442 = vadd.xlane.f32.xlu1 %v441_v35 }
  0x78   : > { %446 = vadd.xlane.f32.xlu0 %v445_v37 }
  0xa5   : > { %v255_v7 = vpop.xlane.xlu0 %254 }
  0xa6   : > { %v449_v61 = vmul.f32 0.0052083335, %v255_v7  ;;  %v263_v41 = vpop.xlane.xlu1 %262 }
  0xa7   : > { %v451_v19 = vmul.f32 0.0052083335, %v263_v41 }
  0xa8   : > { %v2126_v53 = vsub.f32 %v1685_v0, %v449_v61  ;;  %v2129_v57 = vsub.f32 %v1688_v1, %v449_v61 }
  0xa9   : > { %v2132_v29 = vsub.f32 %v1691_v2, %v451_v19  ;;  %v2135_v25 = vsub.f32 %v1696_v4, %v451_v19  ;;  %v259_v21 = vpop.xlane.xlu0 %258 }
  0xaa   : > { %3314 = vst [vmem:[#allocation48_spill] sm:$0xff] %v2126_v53  ;;  %3315 = vst [vmem:[#allocation49_spill] sm:$0xff] %v2129_v57  ;;  %v450_v51 = vmul.f32 0.0052083335, %v259_v21  ;;  %v267_v35 = vpop.xlane.xlu1 %266  ;;  %v596_v7 = vmul.f32 %v2126_v53, %v2126_v53  ;;  %v597_v37 = vmul.f32 %v2129_v57, %v2129_v57 }
  0xab   : > { %3316 = vst [vmem:[#allocation50_spill] sm:$0xff] %v2132_v29  ;;  %3317 = vst [vmem:[#allocation51_spill] sm:$0xff] %v2135_v25  ;;  %v452_v0 = vmul.f32 0.0052083335, %v267_v35  ;;  %v600_v1 = vmul.f32 %v2132_v29, %v2132_v29  ;;  %v601_v2 = vmul.f32 %v2135_v25, %v2135_v25 }
  0xac   : > { %v2146_v41 = vsub.f32 %v1699_v5, %v450_v51  ;;  %v2149_v4 = vsub.f32 %v1702_v6, %v450_v51  ;;  %v694_v19 = vsel %vm251_vm0, %v597_v37, 0.0 }
  0xad   : > { %v2153_v61 = vsub.f32 %v1710_v10, %v452_v0  ;;  %v2156_v21 = vsub.f32 %v1713_v11, %v452_v0  ;;  %v271_v35 = vpop.xlane.xlu0 %270  ;;  %v695_v57 = vadd.f32 %v694_v19, %v596_v7  ;;  %v702_v29 = vsel %vm251_vm0, %v601_v2, 0.0 }
  0xae   : > { %v453_v53 = vmul.f32 0.0052083335, %v271_v35  ;;  %v275_v25 = vpop.xlane.xlu1 %274  ;;  %v598_v5 = vmul.f32 %v2146_v41, %v2146_v41  ;;  %v599_v6 = vmul.f32 %v2149_v4, %v2149_v4  ;;  %v703_v37 = vadd.f32 %v702_v29, %v600_v1 }
  0xaf   : > { %3318 = vst [vmem:[#allocation52_spill] sm:$0xff] %v2156_v21  ;;  %696 = vadd.xlane.f32.xlu1 %v695_v57  ;;  %v454_v51 = vmul.f32 0.0052083335, %v275_v25  ;;  %v602_v10 = vmul.f32 %v2153_v61, %v2153_v61  ;;  %v603_v11 = vmul.f32 %v2156_v21, %v2156_v21 }
  0xb0   : > { %v2168_v7 = vsub.f32 %v1727_v18, %v453_v53  ;;  %v2171_v0 = vsub.f32 %v1719_v14, %v453_v53  ;;  %v698_v2 = vsel %vm251_vm0, %v599_v6, 0.0 }
  0xb1   : > { %v2175_v19 = vsub.f32 %v1732_v20, %v454_v51  ;;  %v2178_v57 = vsub.f32 %v1722_v15, %v454_v51  ;;  %v279_v29 = vpop.xlane.xlu0 %278  ;;  %v699_v25 = vadd.f32 %v698_v2, %v598_v5  ;;  %v706_v1 = vsel %vm251_vm0, %v603_v11, 0.0 }
  0xb2   : > { %v455_v35 = vmul.f32 0.0052083335, %v279_v29  ;;  %v283_v21 = vpop.xlane.xlu1 %282  ;;  %v604_v18 = vmul.f32 %v2168_v7, %v2168_v7  ;;  %v605_v14 = vmul.f32 %v2171_v0, %v2171_v0  ;;  %v707_v20 = vadd.f32 %v706_v1, %v602_v10 }
  0xb3   : > { %704 = vadd.xlane.f32.xlu1 %v703_v37  ;;  %700 = vadd.xlane.f32.xlu0 %v699_v25  ;;  %v456_v53 = vmul.f32 0.0052083335, %v283_v21  ;;  %v606_v15 = vmul.f32 %v2175_v19, %v2175_v19  ;;  %v607_v5 = vmul.f32 %v2178_v57, %v2178_v57 }
  0xb4   : > { %v2190_v6 = vsub.f32 %v1745_v26, %v455_v35  ;;  %v2193_v51 = vsub.f32 %v1737_v22, %v455_v35  ;;  %v710_v11 = vsel %vm251_vm0, %v605_v14, 0.0 }
  0xb5   : > { %v2197_v2 = vsub.f32 %v1750_v28, %v456_v53  ;;  %v2200_v21 = vsub.f32 %v1740_v23, %v456_v53  ;;  %v287_v37 = vpop.xlane.xlu0 %286  ;;  %v711_v10 = vadd.f32 %v710_v11, %v604_v18  ;;  %v714_v29 = vsel %vm251_vm0, %v607_v5, 0.0 }
  0xb6   : > { %v457_v25 = vmul.f32 0.0052083335, %v287_v37  ;;  %v291_v1 = vpop.xlane.xlu1 %290  ;;  %v608_v26 = vmul.f32 %v2190_v6, %v2190_v6  ;;  %v609_v22 = vmul.f32 %v2193_v51, %v2193_v51  ;;  %v715_v28 = vadd.f32 %v714_v29, %v606_v15 }
  0xb7   : > { %708 = vadd.xlane.f32.xlu0 %v707_v20  ;;  %712 = vadd.xlane.f32.xlu1 %v711_v10  ;;  %v458_v35 = vmul.f32 0.0052083335, %v291_v1  ;;  %v610_v23 = vmul.f32 %v2197_v2, %v2197_v2  ;;  %v611_v18 = vmul.f32 %v2200_v21, %v2200_v21 }
  0xb8   : > { %v2212_v14 = vsub.f32 %v1763_v34, %v457_v25  ;;  %v2215_v53 = vsub.f32 %v1755_v30, %v457_v25  ;;  %v718_v5 = vsel %vm251_vm0, %v609_v22, 0.0 }
  0xb9   : > { %v2219_v11 = vsub.f32 %v1768_v36, %v458_v35  ;;  %v2222_v20 = vsub.f32 %v1758_v31, %v458_v35  ;;  %v295_v15 = vpop.xlane.xlu0 %294  ;;  %v719_v37 = vadd.f32 %v718_v5, %v608_v26  ;;  %v722_v10 = vsel %vm251_vm0, %v611_v18, 0.0 }
  0xba   : > { %v459_v29 = vmul.f32 0.0052083335, %v295_v15  ;;  %v299_v1 = vpop.xlane.xlu1 %298  ;;  %v612_v34 = vmul.f32 %v2212_v14, %v2212_v14  ;;  %v613_v30 = vmul.f32 %v2215_v53, %v2215_v53  ;;  %v723_v36 = vadd.f32 %v722_v10, %v610_v23 }
  0xbb   : > { %716 = vadd.xlane.f32.xlu0 %v715_v28  ;;  %720 = vadd.xlane.f32.xlu1 %v719_v37  ;;  %v460_v25 = vmul.f32 0.0052083335, %v299_v1  ;;  %v614_v31 = vmul.f32 %v2219_v11, %v2219_v11  ;;  %v615_v26 = vmul.f32 %v2222_v20, %v2222_v20 }
  0xbc   : > { %v2234_v22 = vsub.f32 %v1781_v42, %v459_v29  ;;  %v2237_v35 = vsub.f32 %v1773_v38, %v459_v29  ;;  %v726_v18 = vsel %vm251_vm0, %v613_v30, 0.0 }
  0xbd   : > { %v2241_v5 = vsub.f32 %v1786_v44, %v460_v25  ;;  %v2244_v28 = vsub.f32 %v1776_v39, %v460_v25  ;;  %v303_v23 = vpop.xlane.xlu0 %302  ;;  %v727_v15 = vadd.f32 %v726_v18, %v612_v34  ;;  %v730_v37 = vsel %vm251_vm0, %v615_v26, 0.0 }
  0xbe   : > { %v461_v10 = vmul.f32 0.0052083335, %v303_v23  ;;  %v307_v1 = vpop.xlane.xlu1 %306  ;;  %v616_v42 = vmul.f32 %v2234_v22, %v2234_v22  ;;  %v617_v38 = vmul.f32 %v2237_v35, %v2237_v35  ;;  %v731_v44 = vadd.f32 %v730_v37, %v614_v31 }
  0xbf   : > { %724 = vadd.xlane.f32.xlu0 %v723_v36  ;;  %728 = vadd.xlane.f32.xlu1 %v727_v15  ;;  %v462_v29 = vmul.f32 0.0052083335, %v307_v1  ;;  %v618_v39 = vmul.f32 %v2241_v5, %v2241_v5  ;;  %v619_v34 = vmul.f32 %v2244_v28, %v2244_v28 }
  0xc0   : > { %v2256_v30 = vsub.f32 %v1799_v50, %v461_v10  ;;  %v2259_v25 = vsub.f32 %v1791_v46, %v461_v10  ;;  %v734_v26 = vsel %vm251_vm0, %v617_v38, 0.0 }
  0xc1   : > { %v2263_v18 = vsub.f32 %v1804_v52, %v462_v29  ;;  %v2266_v36 = vsub.f32 %v1794_v47, %v462_v29  ;;  %v311_v31 = vpop.xlane.xlu0 %310  ;;  %v735_v23 = vadd.f32 %v734_v26, %v616_v42  ;;  %v738_v15 = vsel %vm251_vm0, %v619_v34, 0.0 }
  0xc2   : > { %v463_v37 = vmul.f32 0.0052083335, %v311_v31  ;;  %v315_v1 = vpop.xlane.xlu1 %314  ;;  %v620_v50 = vmul.f32 %v2256_v30, %v2256_v30  ;;  %v621_v46 = vmul.f32 %v2259_v25, %v2259_v25  ;;  %v739_v52 = vadd.f32 %v738_v15, %v618_v39 }
  0xc3   : > { %732 = vadd.xlane.f32.xlu0 %v731_v44  ;;  %736 = vadd.xlane.f32.xlu1 %v735_v23  ;;  %v464_v10 = vmul.f32 0.0052083335, %v315_v1  ;;  %v622_v47 = vmul.f32 %v2263_v18, %v2263_v18  ;;  %v623_v42 = vmul.f32 %v2266_v36, %v2266_v36 }
  0xc4   : > { %v2278_v38 = vsub.f32 %v1817_v58, %v463_v37  ;;  %v2281_v29 = vsub.f32 %v1809_v54, %v463_v37  ;;  %v742_v34 = vsel %vm251_vm0, %v621_v46, 0.0 }
  0xc5   : > { %v2285_v26 = vsub.f32 %v1822_v60, %v464_v10  ;;  %v2288_v44 = vsub.f32 %v1812_v55, %v464_v10  ;;  %v319_v39 = vpop.xlane.xlu0 %318  ;;  %v743_v31 = vadd.f32 %v742_v34, %v620_v50  ;;  %v746_v23 = vsel %vm251_vm0, %v623_v42, 0.0 }
  0xc6   : > { %v465_v15 = vmul.f32 0.0052083335, %v319_v39  ;;  %v323_v1 = vpop.xlane.xlu1 %322  ;;  %v624_v58 = vmul.f32 %v2278_v38, %v2278_v38  ;;  %v625_v54 = vmul.f32 %v2281_v29, %v2281_v29  ;;  %v747_v60 = vadd.f32 %v746_v23, %v622_v47 }
  0xc7   : > { %740 = vadd.xlane.f32.xlu0 %v739_v52  ;;  %744 = vadd.xlane.f32.xlu1 %v743_v31  ;;  %v466_v37 = vmul.f32 0.0052083335, %v323_v1  ;;  %v626_v55 = vmul.f32 %v2285_v26, %v2285_v26  ;;  %v627_v50 = vmul.f32 %v2288_v44, %v2288_v44 }
  0xc8   : > { %v2300_v46 = vsub.f32 %v1835_v8, %v465_v15  ;;  %v2303_v10 = vsub.f32 %v1827_v62, %v465_v15  ;;  %v750_v42 = vsel %vm251_vm0, %v625_v54, 0.0 }
  0xc9   : > { %v2307_v34 = vsub.f32 %v1840_v12, %v466_v37  ;;  %v2310_v52 = vsub.f32 %v1830_v63, %v466_v37  ;;  %v327_v47 = vpop.xlane.xlu0 %326  ;;  %v751_v39 = vadd.f32 %v750_v42, %v624_v58  ;;  %v754_v31 = vsel %vm251_vm0, %v627_v50, 0.0 }
  0xca   : > { %v467_v23 = vmul.f32 0.0052083335, %v327_v47  ;;  %v331_v1 = vpop.xlane.xlu1 %330  ;;  %v628_v8 = vmul.f32 %v2300_v46, %v2300_v46  ;;  %v629_v62 = vmul.f32 %v2303_v10, %v2303_v10  ;;  %v755_v12 = vadd.f32 %v754_v31, %v626_v55 }
  0xcb   : > { %748 = vadd.xlane.f32.xlu0 %v747_v60  ;;  %752 = vadd.xlane.f32.xlu1 %v751_v39  ;;  %v468_v15 = vmul.f32 0.0052083335, %v331_v1  ;;  %v630_v63 = vmul.f32 %v2307_v34, %v2307_v34  ;;  %v631_v58 = vmul.f32 %v2310_v52, %v2310_v52 }
  0xcc   : > { %v2322_v54 = vsub.f32 %v1853_v24, %v467_v23  ;;  %v2325_v37 = vsub.f32 %v1845_v16, %v467_v23  ;;  %v758_v50 = vsel %vm251_vm0, %v629_v62, 0.0 }
  0xcd   : > { %v2329_v42 = vsub.f32 %v1858_v27, %v468_v15  ;;  %v2332_v60 = vsub.f32 %v1848_v17, %v468_v15  ;;  %v335_v55 = vpop.xlane.xlu0 %334  ;;  %v759_v47 = vadd.f32 %v758_v50, %v628_v8  ;;  %v762_v39 = vsel %vm251_vm0, %v631_v58, 0.0 }
  0xce   : > { %v469_v31 = vmul.f32 0.0052083335, %v335_v55  ;;  %v339_v1 = vpop.xlane.xlu1 %338  ;;  %v632_v24 = vmul.f32 %v2322_v54, %v2322_v54  ;;  %v633_v16 = vmul.f32 %v2325_v37, %v2325_v37  ;;  %v763_v27 = vadd.f32 %v762_v39, %v630_v63 }
  0xcf   : > { %756 = vadd.xlane.f32.xlu0 %v755_v12  ;;  %760 = vadd.xlane.f32.xlu1 %v759_v47  ;;  %v470_v23 = vmul.f32 0.0052083335, %v339_v1  ;;  %v634_v17 = vmul.f32 %v2329_v42, %v2329_v42  ;;  %v635_v8 = vmul.f32 %v2332_v60, %v2332_v60 }
  0xd0   : > { %v2344_v62 = vsub.f32 %v1871_v40, %v469_v31  ;;  %v2347_v15 = vsub.f32 %v1863_v32, %v469_v31  ;;  %v766_v58 = vsel %vm251_vm0, %v633_v16, 0.0 }
  0xd1   : > { %v2351_v50 = vsub.f32 %v1876_v43, %v470_v23  ;;  %v2354_v12 = vsub.f32 %v1866_v33, %v470_v23  ;;  %v343_v63 = vpop.xlane.xlu0 %342  ;;  %v767_v55 = vadd.f32 %v766_v58, %v632_v24  ;;  %v770_v47 = vsel %vm251_vm0, %v635_v8, 0.0 }
  0xd2   : > { %v471_v39 = vmul.f32 0.0052083335, %v343_v63  ;;  %v347_v1 = vpop.xlane.xlu1 %346  ;;  %v636_v40 = vmul.f32 %v2344_v62, %v2344_v62  ;;  %v637_v32 = vmul.f32 %v2347_v15, %v2347_v15  ;;  %v771_v43 = vadd.f32 %v770_v47, %v634_v17 }
  0xd3   : > { %3319 = vst [vmem:[#allocation53_spill] sm:$0xff] %v2351_v50  ;;  %3320 = vst [vmem:[#allocation54_spill] sm:$0xff] %v2354_v12  ;;  %764 = vadd.xlane.f32.xlu0 %v763_v27  ;;  %768 = vadd.xlane.f32.xlu1 %v767_v55  ;;  %v472_v31 = vmul.f32 0.0052083335, %v347_v1  ;;  %v638_v33 = vmul.f32 %v2351_v50, %v2351_v50  ;;  %v639_v24 = vmul.f32 %v2354_v12, %v2354_v12  ;;  %v3327_v12 = vld [vmem:[#allocation5_spill] sm:$0xff] }
  0xd4   : > { %v2366_v16 = vsub.f32 %v1889_v56, %v471_v39  ;;  %v2369_v23 = vsub.f32 %v1881_v48, %v471_v39  ;;  %v774_v8 = vsel %vm251_vm0, %v637_v32, 0.0  ;;  %v3323_v32 = vld [vmem:[#allocation4_spill] sm:$0xff] }
  0xd5   : > { %v2373_v58 = vsub.f32 %v1894_v59, %v472_v31  ;;  %v2376_v27 = vsub.f32 %v1884_v49, %v472_v31  ;;  %v351_v17 = vpop.xlane.xlu0 %350  ;;  %v775_v63 = vadd.f32 %v774_v8, %v636_v40  ;;  %v778_v55 = vsel %vm251_vm0, %v639_v24, 0.0  ;;  %v3325_v24 = vld [vmem:[#allocation2_spill] sm:$0xff] }
  0xd6   : > { %v473_v47 = vmul.f32 0.0052083335, %v351_v17  ;;  %v355_v1 = vpop.xlane.xlu1 %354  ;;  %v640_v56 = vmul.f32 %v2366_v16, %v2366_v16  ;;  %v641_v48 = vmul.f32 %v2369_v23, %v2369_v23  ;;  %v779_v59 = vadd.f32 %v778_v55, %v638_v33 }
  0xd7   : > { %3321 = vst [vmem:[#allocation55_spill] sm:$0xff] %v2373_v58  ;;  %3322 = vst [vmem:[#allocation56_spill] sm:$0xff] %v2376_v27  ;;  %772 = vadd.xlane.f32.xlu0 %v771_v43  ;;  %776 = vadd.xlane.f32.xlu1 %v775_v63  ;;  %v474_v39 = vmul.f32 0.0052083335, %v355_v1  ;;  %v642_v49 = vmul.f32 %v2373_v58, %v2373_v58  ;;  %v643_v40 = vmul.f32 %v2376_v27, %v2376_v27  ;;  %v3329_v43 = vld [vmem:[#allocation3_spill] sm:$0xff] }
  0xd8   : > { %v2388_v31 = vsub.f32 %v3323_v32, %v473_v47  ;;  %v2391_v8 = vsub.f32 %v3325_v24, %v473_v47  ;;  %v782_v17 = vsel %vm251_vm0, %v641_v48, 0.0  ;;  %v3331_v24 = vld [vmem:[#allocation8_spill] sm:$0xff] }
  0xd9   : > { %v2395_v50 = vsub.f32 %v3327_v12, %v474_v39  ;;  %v2398_v63 = vsub.f32 %v3329_v43, %v474_v39  ;;  %v359_v33 = vpop.xlane.xlu0 %358  ;;  %v783_v55 = vadd.f32 %v782_v17, %v640_v56  ;;  %v786_v1 = vsel %vm251_vm0, %v643_v40, 0.0  ;;  %v3333_v17 = vld [vmem:[#allocation6_spill] sm:$0xff] }
  0xda   : > { %3324 = vst [vmem:[#allocation4_spill] sm:$0xff] %v2388_v31  ;;  %3326 = vst [vmem:[#allocation2_spill] sm:$0xff] %v2391_v8  ;;  %v475_v58 = vmul.f32 0.0052083335, %v359_v33  ;;  %v363_v27 = vpop.xlane.xlu1 %362  ;;  %v644_v32 = vmul.f32 %v2388_v31, %v2388_v31  ;;  %v645_v47 = vmul.f32 %v2391_v8, %v2391_v8  ;;  %v787_v12 = vadd.f32 %v786_v1, %v642_v49  ;;  %v3335_v31 = vld [vmem:[#allocation9_spill] sm:$0xff] }
  0xdb   : > { %3328 = vst [vmem:[#allocation5_spill] sm:$0xff] %v2395_v50  ;;  %3330 = vst [vmem:[#allocation3_spill] sm:$0xff] %v2398_v63  ;;  %780 = vadd.xlane.f32.xlu0 %v779_v59  ;;  %784 = vadd.xlane.f32.xlu1 %v783_v55  ;;  %v476_v48 = vmul.f32 0.0052083335, %v363_v27  ;;  %v646_v39 = vmul.f32 %v2395_v50, %v2395_v50  ;;  %v647_v56 = vmul.f32 %v2398_v63, %v2398_v63  ;;  %v3337_v59 = vld [vmem:[#allocation7_spill] sm:$0xff] }
  0xdc   : > { %v2410_v40 = vsub.f32 %v3331_v24, %v475_v58  ;;  %v2413_v43 = vsub.f32 %v3333_v17, %v475_v58  ;;  %v790_v33 = vsel %vm251_vm0, %v645_v47, 0.0  ;;  %v3339_v17 = vld [vmem:[#allocation12_spill] sm:$0xff] }
  0xdd   : > { %v2417_v8 = vsub.f32 %v3335_v31, %v476_v48  ;;  %v2420_v27 = vsub.f32 %v3337_v59, %v476_v48  ;;  %v367_v49 = vpop.xlane.xlu0 %366  ;;  %v791_v55 = vadd.f32 %v790_v33, %v644_v32  ;;  %v794_v1 = vsel %vm251_vm0, %v647_v56, 0.0  ;;  %v3341_v33 = vld [vmem:[#allocation10_spill] sm:$0xff] }
  0xde   : > { %3332 = vst [vmem:[#allocation8_spill] sm:$0xff] %v2410_v40  ;;  %3334 = vst [vmem:[#allocation6_spill] sm:$0xff] %v2413_v43  ;;  %v477_v50 = vmul.f32 0.0052083335, %v367_v49  ;;  %v371_v63 = vpop.xlane.xlu1 %370  ;;  %v648_v24 = vmul.f32 %v2410_v40, %v2410_v40  ;;  %v649_v58 = vmul.f32 %v2413_v43, %v2413_v43  ;;  %v795_v31 = vadd.f32 %v794_v1, %v646_v39  ;;  %v3343_v40 = vld [vmem:[#allocation13_spill] sm:$0xff] }
  0xdf   : > { %3336 = vst [vmem:[#allocation9_spill] sm:$0xff] %v2417_v8  ;;  %3338 = vst [vmem:[#allocation7_spill] sm:$0xff] %v2420_v27  ;;  %788 = vadd.xlane.f32.xlu0 %v787_v12  ;;  %792 = vadd.xlane.f32.xlu1 %v791_v55  ;;  %v478_v47 = vmul.f32 0.0052083335, %v371_v63  ;;  %v650_v48 = vmul.f32 %v2417_v8, %v2417_v8  ;;  %v651_v32 = vmul.f32 %v2420_v27, %v2420_v27  ;;  %v3345_v12 = vld [vmem:[#allocation11_spill] sm:$0xff] }
  0xe0   : > { %v2432_v56 = vsub.f32 %v3339_v17, %v477_v50  ;;  %v2435_v59 = vsub.f32 %v3341_v33, %v477_v50  ;;  %v798_v49 = vsel %vm251_vm0, %v649_v58, 0.0  ;;  %v3347_v33 = vld [vmem:[#allocation16_spill] sm:$0xff] }
  0xe1   : > { %v2439_v43 = vsub.f32 %v3343_v40, %v478_v47  ;;  %v2442_v63 = vsub.f32 %v3345_v12, %v478_v47  ;;  %v375_v39 = vpop.xlane.xlu0 %374  ;;  %v799_v55 = vadd.f32 %v798_v49, %v648_v24  ;;  %v802_v1 = vsel %vm251_vm0, %v651_v32, 0.0  ;;  %v3349_v49 = vld [vmem:[#allocation14_spill] sm:$0xff] }
  0xe2   : > { %3340 = vst [vmem:[#allocation12_spill] sm:$0xff] %v2432_v56  ;;  %3342 = vst [vmem:[#allocation10_spill] sm:$0xff] %v2435_v59  ;;  %v479_v8 = vmul.f32 0.0052083335, %v375_v39  ;;  %v379_v27 = vpop.xlane.xlu1 %378  ;;  %v652_v17 = vmul.f32 %v2432_v56, %v2432_v56  ;;  %v653_v50 = vmul.f32 %v2435_v59, %v2435_v59  ;;  %v803_v40 = vadd.f32 %v802_v1, %v650_v48  ;;  %v3351_v56 = vld [vmem:[#allocation17_spill] sm:$0xff] }
  0xe3   : > { %3344 = vst [vmem:[#allocation13_spill] sm:$0xff] %v2439_v43  ;;  %3346 = vst [vmem:[#allocation11_spill] sm:$0xff] %v2442_v63  ;;  %796 = vadd.xlane.f32.xlu0 %v795_v31  ;;  %800 = vadd.xlane.f32.xlu1 %v799_v55  ;;  %v480_v58 = vmul.f32 0.0052083335, %v379_v27  ;;  %v654_v47 = vmul.f32 %v2439_v43, %v2439_v43  ;;  %v655_v24 = vmul.f32 %v2442_v63, %v2442_v63  ;;  %v3353_v31 = vld [vmem:[#allocation15_spill] sm:$0xff] }
  0xe4   : > { %v2454_v32 = vsub.f32 %v3347_v33, %v479_v8  ;;  %v2457_v12 = vsub.f32 %v3349_v49, %v479_v8  ;;  %v806_v39 = vsel %vm251_vm0, %v653_v50, 0.0  ;;  %v3355_v49 = vld [vmem:[#allocation20_spill] sm:$0xff] }
  0xe5   : > { %v2461_v59 = vsub.f32 %v3351_v56, %v480_v58  ;;  %v2464_v27 = vsub.f32 %v3353_v31, %v480_v58  ;;  %v383_v48 = vpop.xlane.xlu0 %382  ;;  %v807_v55 = vadd.f32 %v806_v39, %v652_v17  ;;  %v810_v1 = vsel %vm251_vm0, %v655_v24, 0.0  ;;  %v3357_v39 = vld [vmem:[#allocation18_spill] sm:$0xff] }
  0xe6   : > { %3348 = vst [vmem:[#allocation16_spill] sm:$0xff] %v2454_v32  ;;  %3350 = vst [vmem:[#allocation14_spill] sm:$0xff] %v2457_v12  ;;  %v481_v43 = vmul.f32 0.0052083335, %v383_v48  ;;  %v387_v63 = vpop.xlane.xlu1 %386  ;;  %v656_v33 = vmul.f32 %v2454_v32, %v2454_v32  ;;  %v657_v8 = vmul.f32 %v2457_v12, %v2457_v12  ;;  %v811_v56 = vadd.f32 %v810_v1, %v654_v47  ;;  %v3359_v32 = vld [vmem:[#allocation21_spill] sm:$0xff] }
  0xe7   : > { %3352 = vst [vmem:[#allocation17_spill] sm:$0xff] %v2461_v59  ;;  %3354 = vst [vmem:[#allocation15_spill] sm:$0xff] %v2464_v27  ;;  %804 = vadd.xlane.f32.xlu0 %v803_v40  ;;  %808 = vadd.xlane.f32.xlu1 %v807_v55  ;;  %v482_v50 = vmul.f32 0.0052083335, %v387_v63  ;;  %v658_v58 = vmul.f32 %v2461_v59, %v2461_v59  ;;  %v659_v17 = vmul.f32 %v2464_v27, %v2464_v27  ;;  %v3361_v40 = vld [vmem:[#allocation19_spill] sm:$0xff] }
  0xe8   : > { %v2476_v24 = vsub.f32 %v3355_v49, %v481_v43  ;;  %v2479_v31 = vsub.f32 %v3357_v39, %v481_v43  ;;  %v814_v48 = vsel %vm251_vm0, %v657_v8, 0.0  ;;  %v3363_v39 = vld [vmem:[#allocation24_spill] sm:$0xff] }
  0xe9   : > { %v2483_v12 = vsub.f32 %v3359_v32, %v482_v50  ;;  %v2486_v63 = vsub.f32 %v3361_v40, %v482_v50  ;;  %v391_v47 = vpop.xlane.xlu0 %390  ;;  %v815_v55 = vadd.f32 %v814_v48, %v656_v33  ;;  %v818_v1 = vsel %vm251_vm0, %v659_v17, 0.0  ;;  %v3365_v48 = vld [vmem:[#allocation22_spill] sm:$0xff] }
  0xea   : > { %3356 = vst [vmem:[#allocation20_spill] sm:$0xff] %v2476_v24  ;;  %3358 = vst [vmem:[#allocation18_spill] sm:$0xff] %v2479_v31  ;;  %v483_v59 = vmul.f32 0.0052083335, %v391_v47  ;;  %v395_v27 = vpop.xlane.xlu1 %394  ;;  %v660_v49 = vmul.f32 %v2476_v24, %v2476_v24  ;;  %v661_v43 = vmul.f32 %v2479_v31, %v2479_v31  ;;  %v819_v32 = vadd.f32 %v818_v1, %v658_v58  ;;  %v3367_v24 = vld [vmem:[#allocation25_spill] sm:$0xff] }
  0xeb   : > { %3360 = vst [vmem:[#allocation21_spill] sm:$0xff] %v2483_v12  ;;  %3362 = vst [vmem:[#allocation19_spill] sm:$0xff] %v2486_v63  ;;  %812 = vadd.xlane.f32.xlu0 %v811_v56  ;;  %816 = vadd.xlane.f32.xlu1 %v815_v55  ;;  %v484_v8 = vmul.f32 0.0052083335, %v395_v27  ;;  %v662_v50 = vmul.f32 %v2483_v12, %v2483_v12  ;;  %v663_v33 = vmul.f32 %v2486_v63, %v2486_v63  ;;  %v3369_v56 = vld [vmem:[#allocation23_spill] sm:$0xff] }
  0xec   : > { %v2498_v17 = vsub.f32 %v3363_v39, %v483_v59  ;;  %v2501_v40 = vsub.f32 %v3365_v48, %v483_v59  ;;  %v822_v47 = vsel %vm251_vm0, %v661_v43, 0.0  ;;  %v3371_v48 = vld [vmem:[#allocation28_spill] sm:$0xff] }
  0xed   : > { %v2505_v31 = vsub.f32 %v3367_v24, %v484_v8  ;;  %v2508_v27 = vsub.f32 %v3369_v56, %v484_v8  ;;  %v399_v58 = vpop.xlane.xlu0 %398  ;;  %v823_v55 = vadd.f32 %v822_v47, %v660_v49  ;;  %v826_v1 = vsel %vm251_vm0, %v663_v33, 0.0  ;;  %v3373_v47 = vld [vmem:[#allocation26_spill] sm:$0xff] }
  0xee   : > { %3364 = vst [vmem:[#allocation24_spill] sm:$0xff] %v2498_v17  ;;  %3366 = vst [vmem:[#allocation22_spill] sm:$0xff] %v2501_v40  ;;  %v485_v12 = vmul.f32 0.0052083335, %v399_v58  ;;  %v403_v63 = vpop.xlane.xlu1 %402  ;;  %v664_v39 = vmul.f32 %v2498_v17, %v2498_v17  ;;  %v665_v59 = vmul.f32 %v2501_v40, %v2501_v40  ;;  %v827_v24 = vadd.f32 %v826_v1, %v662_v50  ;;  %v3375_v17 = vld [vmem:[#allocation29_spill] sm:$0xff] }
  0xef   : > { %3368 = vst [vmem:[#allocation25_spill] sm:$0xff] %v2505_v31  ;;  %3370 = vst [vmem:[#allocation23_spill] sm:$0xff] %v2508_v27  ;;  %820 = vadd.xlane.f32.xlu0 %v819_v32  ;;  %824 = vadd.xlane.f32.xlu1 %v823_v55  ;;  %v486_v43 = vmul.f32 0.0052083335, %v403_v63  ;;  %v666_v8 = vmul.f32 %v2505_v31, %v2505_v31  ;;  %v667_v49 = vmul.f32 %v2508_v27, %v2508_v27  ;;  %v3377_v32 = vld [vmem:[#allocation27_spill] sm:$0xff] }
  0xf0   : > { %v2520_v33 = vsub.f32 %v3371_v48, %v485_v12  ;;  %v2523_v56 = vsub.f32 %v3373_v47, %v485_v12  ;;  %v830_v58 = vsel %vm251_vm0, %v665_v59, 0.0  ;;  %v3379_v47 = vld [vmem:[#allocation32_spill] sm:$0xff] }
  0xf1   : > { %v2527_v40 = vsub.f32 %v3375_v17, %v486_v43  ;;  %v2530_v63 = vsub.f32 %v3377_v32, %v486_v43  ;;  %v407_v50 = vpop.xlane.xlu0 %406  ;;  %v831_v55 = vadd.f32 %v830_v58, %v664_v39  ;;  %v834_v1 = vsel %vm251_vm0, %v667_v49, 0.0  ;;  %v3381_v58 = vld [vmem:[#allocation30_spill] sm:$0xff] }
  0xf2   : > { %3372 = vst [vmem:[#allocation28_spill] sm:$0xff] %v2520_v33  ;;  %3374 = vst [vmem:[#allocation26_spill] sm:$0xff] %v2523_v56  ;;  %v487_v31 = vmul.f32 0.0052083335, %v407_v50  ;;  %v411_v27 = vpop.xlane.xlu1 %410  ;;  %v668_v48 = vmul.f32 %v2520_v33, %v2520_v33  ;;  %v669_v12 = vmul.f32 %v2523_v56, %v2523_v56  ;;  %v835_v17 = vadd.f32 %v834_v1, %v666_v8  ;;  %v3383_v33 = vld [vmem:[#allocation33_spill] sm:$0xff] }
  0xf3   : > { %3376 = vst [vmem:[#allocation29_spill] sm:$0xff] %v2527_v40  ;;  %3378 = vst [vmem:[#allocation27_spill] sm:$0xff] %v2530_v63  ;;  %828 = vadd.xlane.f32.xlu0 %v827_v24  ;;  %832 = vadd.xlane.f32.xlu1 %v831_v55  ;;  %v488_v59 = vmul.f32 0.0052083335, %v411_v27  ;;  %v670_v43 = vmul.f32 %v2527_v40, %v2527_v40  ;;  %v671_v39 = vmul.f32 %v2530_v63, %v2530_v63  ;;  %v3385_v24 = vld [vmem:[#allocation31_spill] sm:$0xff] }
  0xf4   : > { %v2542_v49 = vsub.f32 %v3379_v47, %v487_v31  ;;  %v2545_v32 = vsub.f32 %v3381_v58, %v487_v31  ;;  %v838_v50 = vsel %vm251_vm0, %v669_v12, 0.0  ;;  %v3387_v58 = vld [vmem:[#allocation36_spill] sm:$0xff] }
  0xf5   : > { %v2549_v56 = vsub.f32 %v3383_v33, %v488_v59  ;;  %v2552_v27 = vsub.f32 %v3385_v24, %v488_v59  ;;  %v415_v8 = vpop.xlane.xlu0 %414  ;;  %v839_v55 = vadd.f32 %v838_v50, %v668_v48  ;;  %v842_v1 = vsel %vm251_vm0, %v671_v39, 0.0  ;;  %v3389_v50 = vld [vmem:[#allocation34_spill] sm:$0xff] }
  0xf6   : > { %3380 = vst [vmem:[#allocation32_spill] sm:$0xff] %v2542_v49  ;;  %3382 = vst [vmem:[#allocation30_spill] sm:$0xff] %v2545_v32  ;;  %v489_v40 = vmul.f32 0.0052083335, %v415_v8  ;;  %v419_v63 = vpop.xlane.xlu1 %418  ;;  %v672_v47 = vmul.f32 %v2542_v49, %v2542_v49  ;;  %v673_v31 = vmul.f32 %v2545_v32, %v2545_v32  ;;  %v843_v33 = vadd.f32 %v842_v1, %v670_v43  ;;  %v3391_v49 = vld [vmem:[#allocation37_spill] sm:$0xff] }
  0xf7   : > { %3384 = vst [vmem:[#allocation33_spill] sm:$0xff] %v2549_v56  ;;  %3386 = vst [vmem:[#allocation31_spill] sm:$0xff] %v2552_v27  ;;  %836 = vadd.xlane.f32.xlu0 %v835_v17  ;;  %840 = vadd.xlane.f32.xlu1 %v839_v55  ;;  %v490_v12 = vmul.f32 0.0052083335, %v419_v63  ;;  %v674_v59 = vmul.f32 %v2549_v56, %v2549_v56  ;;  %v675_v48 = vmul.f32 %v2552_v27, %v2552_v27  ;;  %v3393_v17 = vld [vmem:[#allocation35_spill] sm:$0xff] }
  0xf8   : > { %v2564_v39 = vsub.f32 %v3387_v58, %v489_v40  ;;  %v2567_v24 = vsub.f32 %v3389_v50, %v489_v40  ;;  %v846_v8 = vsel %vm251_vm0, %v673_v31, 0.0  ;;  %v3395_v50 = vld [vmem:[#allocation40_spill] sm:$0xff] }
  0xf9   : > { %v2571_v32 = vsub.f32 %v3391_v49, %v490_v12  ;;  %v2574_v63 = vsub.f32 %v3393_v17, %v490_v12  ;;  %v423_v43 = vpop.xlane.xlu0 %422  ;;  %v847_v55 = vadd.f32 %v846_v8, %v672_v47  ;;  %v850_v1 = vsel %vm251_vm0, %v675_v48, 0.0  ;;  %v3397_v8 = vld [vmem:[#allocation38_spill] sm:$0xff] }
  0xfa   : > { %3388 = vst [vmem:[#allocation36_spill] sm:$0xff] %v2564_v39  ;;  %3390 = vst [vmem:[#allocation34_spill] sm:$0xff] %v2567_v24  ;;  %v491_v56 = vmul.f32 0.0052083335, %v423_v43  ;;  %v427_v27 = vpop.xlane.xlu1 %426  ;;  %v676_v58 = vmul.f32 %v2564_v39, %v2564_v39  ;;  %v677_v40 = vmul.f32 %v2567_v24, %v2567_v24  ;;  %v851_v49 = vadd.f32 %v850_v1, %v674_v59  ;;  %v3399_v39 = vld [vmem:[#allocation41_spill] sm:$0xff] }
  0xfb   : > { %3392 = vst [vmem:[#allocation37_spill] sm:$0xff] %v2571_v32  ;;  %3394 = vst [vmem:[#allocation35_spill] sm:$0xff] %v2574_v63  ;;  %844 = vadd.xlane.f32.xlu0 %v843_v33  ;;  %848 = vadd.xlane.f32.xlu1 %v847_v55  ;;  %v492_v31 = vmul.f32 0.0052083335, %v427_v27  ;;  %v678_v12 = vmul.f32 %v2571_v32, %v2571_v32  ;;  %v679_v47 = vmul.f32 %v2574_v63, %v2574_v63  ;;  %v3401_v33 = vld [vmem:[#allocation39_spill] sm:$0xff] }
  0xfc   : > { %v2586_v48 = vsub.f32 %v3395_v50, %v491_v56  ;;  %v2589_v17 = vsub.f32 %v3397_v8, %v491_v56  ;;  %v854_v43 = vsel %vm251_vm0, %v677_v40, 0.0  ;;  %v3403_v8 = vld [vmem:[#allocation44_spill] sm:$0xff] }
  0xfd   : > { %v2593_v24 = vsub.f32 %v3399_v39, %v492_v31  ;;  %v2596_v27 = vsub.f32 %v3401_v33, %v492_v31  ;;  %v431_v59 = vpop.xlane.xlu0 %430  ;;  %v855_v55 = vadd.f32 %v854_v43, %v676_v58  ;;  %v858_v1 = vsel %vm251_vm0, %v679_v47, 0.0  ;;  %v3404_v43 = vld [vmem:[#allocation42_spill] sm:$0xff] }
  0xfe   : > { %3396 = vst [vmem:[#allocation40_spill] sm:$0xff] %v2586_v48  ;;  %3398 = vst [vmem:[#allocation38_spill] sm:$0xff] %v2589_v17  ;;  %v493_v32 = vmul.f32 0.0052083335, %v431_v59  ;;  %v435_v63 = vpop.xlane.xlu1 %434  ;;  %v680_v50 = vmul.f32 %v2586_v48, %v2586_v48  ;;  %v681_v56 = vmul.f32 %v2589_v17, %v2589_v17  ;;  %v859_v39 = vadd.f32 %v858_v1, %v678_v12  ;;  %v3405_v48 = vld [vmem:[#allocation45_spill] sm:$0xff] }
  0xff   : > { %3400 = vst [vmem:[#allocation41_spill] sm:$0xff] %v2593_v24  ;;  %3402 = vst [vmem:[#allocation39_spill] sm:$0xff] %v2596_v27  ;;  %852 = vadd.xlane.f32.xlu0 %v851_v49  ;;  %856 = vadd.xlane.f32.xlu1 %v855_v55  ;;  %v494_v40 = vmul.f32 0.0052083335, %v435_v63  ;;  %v682_v31 = vmul.f32 %v2593_v24, %v2593_v24  ;;  %v683_v58 = vmul.f32 %v2596_v27, %v2596_v27  ;;  %v3407_v49 = vld [vmem:[#allocation43_spill] sm:$0xff] }
 0x100   : > { %v2608_v47 = vsub.f32 %v3403_v8, %v493_v32  ;;  %v2611_v33 = vsub.f32 %v3404_v43, %v493_v32  ;;  %v862_v59 = vsel %vm251_vm0, %v681_v56, 0.0  ;;  %v3410_v43 = vld [vmem:[#allocation46_spill] sm:$0xff] }
 0x101   : > { %v2615_v17 = vsub.f32 %v3405_v48, %v494_v40  ;;  %v2618_v63 = vsub.f32 %v3407_v49, %v494_v40  ;;  %v439_v12 = vpop.xlane.xlu0 %438  ;;  %v863_v55 = vadd.f32 %v862_v59, %v680_v50  ;;  %v866_v1 = vsel %vm251_vm0, %v683_v58, 0.0 }
 0x102   : > { %v495_v24 = vmul.f32 0.0052083335, %v439_v12  ;;  %v443_v27 = vpop.xlane.xlu1 %442  ;;  %v684_v8 = vmul.f32 %v2608_v47, %v2608_v47  ;;  %v685_v32 = vmul.f32 %v2611_v33, %v2611_v33  ;;  %v867_v48 = vadd.f32 %v866_v1, %v682_v31 }
 0x103   : > { %3406 = vst [vmem:[#allocation44_spill] sm:$0xff] %v2615_v17  ;;  %3408 = vst [vmem:[#allocation42_spill] sm:$0xff] %v2618_v63  ;;  %860 = vadd.xlane.f32.xlu0 %v859_v39  ;;  %864 = vadd.xlane.f32.xlu1 %v863_v55  ;;  %v496_v56 = vmul.f32 0.0052083335, %v443_v27  ;;  %v686_v40 = vmul.f32 %v2615_v17, %v2615_v17  ;;  %v687_v50 = vmul.f32 %v2618_v63, %v2618_v63  ;;  %v3413_v39 = vld [vmem:[#allocation47_spill] sm:$0xff] }
 0x104   : > { %v2630_v58 = vsub.f32 %v2105_v13, %v495_v24  ;;  %v2633_v59 = vsub.f32 %v3410_v43, %v495_v24  ;;  %v870_v49 = vsel %vm251_vm0, %v685_v32, 0.0 }
 0x105   : > { %v2637_v12 = vsub.f32 %v2110_v3, %v496_v56  ;;  %v2640_v27 = vsub.f32 %v3413_v39, %v496_v56  ;;  %v447_v31 = vpop.xlane.xlu0 %446  ;;  %v871_v55 = vadd.f32 %v870_v49, %v684_v8  ;;  %v874_v1 = vsel %vm251_vm0, %v687_v50, 0.0 }
 0x106   : > { %3409 = vst [vmem:[#allocation45_spill] sm:$0xff] %v2630_v58  ;;  %3411 = vst [vmem:[#allocation43_spill] sm:$0xff] %v2633_v59  ;;  %v497_v17 = vmul.f32 0.0052083335, %v447_v31  ;;  %v688_v13 = vmul.f32 %v2630_v58, %v2630_v58  ;;  %v689_v24 = vmul.f32 %v2633_v59, %v2633_v59  ;;  %v875_v32 = vadd.f32 %v874_v1, %v686_v40 }
 0x107   : > { %3412 = vst [vmem:[#allocation46_spill] sm:$0xff] %v2637_v12  ;;  %3414 = vst [vmem:[#allocation47_spill] sm:$0xff] %v2640_v27  ;;  %868 = vadd.xlane.f32.xlu0 %v867_v48  ;;  %872 = vadd.xlane.f32.xlu1 %v871_v55  ;;  %v690_v3 = vmul.f32 %v2637_v12, %v2637_v12  ;;  %v691_v56 = vmul.f32 %v2640_v27, %v2640_v27 }
 0x108   : > { %v2652_v8 = vsub.f32 %v2120_v45, %v497_v17  ;;  %v2655_v50 = vsub.f32 %v2115_v9, %v497_v17  ;;  %v878_v43 = vsel %vm251_vm0, %v689_v24, 0.0  ;;  %v1136_v9 = vlaneseq }
 0x109   : > { %v879_v49 = vadd.f32 %v878_v43, %v688_v13  ;;  %v882_v39 = vsel %vm251_vm0, %v691_v56, 0.0 }
 0x10a   : > { %3415 = vst [vmem:[#allocation57_spill] sm:$0xff] %v2652_v8  ;;  %3416 = vst [vmem:[#allocation58_spill] sm:$0xff] %v2655_v50  ;;  %v692_v48 = vmul.f32 %v2652_v8, %v2652_v8  ;;  %v693_v40 = vmul.f32 %v2655_v50, %v2655_v50  ;;  %v883_v31 = vadd.f32 %v882_v39, %v690_v3  ;;  %v1137_v13 = vshrl.u32 %v1136_v9, 7 }
 0x10b   : > { %876 = vadd.xlane.f32.xlu0 %v875_v32  ;;  %880 = vadd.xlane.f32.xlu1 %v879_v49  ;;  %v250_v32 = vld [vmem:[%s3163_s1] sm:$0xf] }
 0x10c   : > { %v886_v45 = vsel %vm251_vm0, %v693_v40, 0.0  ;;  %v1138_v8 = vsub.s32 0, %v1137_v13  ;;  %v1142_v50 = vsub.s32 2, %v1137_v13  ;;  %v1254_v39 = vsub.s32 1, %v1137_v13 }
 0x10d   : > { %v887_v55 = vadd.f32 %v886_v45, %v692_v48  ;;  %v1258_v48 = vsub.s32 3, %v1137_v13 }
 0x10e   : > { %v1139_v9 = vrot.slane %v250_v32, %v1138_v8 }
 0x10f   : > { %884 = vadd.xlane.f32.xlu0 %v883_v31  ;;  %888 = vadd.xlane.f32.xlu1 %v887_v55 }
 0x13c   : > { %v697_v17 = vpop.xlane.xlu1 %696 }
 0x13d   : > { %v890_v1 = vmul.f32 0.0052083335, %v697_v17  ;;  %v1143_v17 = vrot.slane %v250_v32, %v1142_v50 }
 0x13f   : > { %v939_v24 = vadd.f32 1e-06, %v890_v1  ;;  %v2669_v13 = vrot.slane %v1143_v17, %v1138_v8 }
 0x140   : > { %v705_v56 = vpop.xlane.xlu1 %704  ;;  %v701_v43 = vpop.xlane.xlu0 %700 }
 0x141   : > { %1545 = vrsqrt.f32 %v939_v24  ;;  %v892_v27 = vmul.f32 0.0052083335, %v705_v56  ;;  %v891_v12 = vmul.f32 0.0052083335, %v701_v43  ;;  %v1255_v56 = vrot.slane %v250_v32, %v1254_v39 }
 0x142   : > { %v1259_v43 = vrot.slane %v250_v32, %v1258_v48  ;;  %v3418_v48 = vld [vmem:[#allocation49_spill] sm:$0xff] }
 0x143   : > { %v941_v3 = vadd.f32 1e-06, %v892_v27  ;;  %v940_v49 = vadd.f32 1e-06, %v891_v12  ;;  %v2667_v12 = vrot.slane %v1139_v9, %v1138_v8  ;;  %v2671_v50 = vrot.slane %v1255_v56, %v1254_v39 }
 0x144   : > { %v713_v40 = vpop.xlane.xlu1 %712  ;;  %v709_v31 = vpop.xlane.xlu0 %708 }
 0x145   : > { %1547 = vrsqrt.f32 %v941_v3  ;;  %v894_v45 = vmul.f32 0.0052083335, %v713_v40  ;;  %v893_v55 = vmul.f32 0.0052083335, %v709_v31 }
 0x146   : > { %1549 = vrsqrt.f32 %v940_v49  ;;  %v2673_v49 = vrot.slane %v1259_v43, %v1254_v39 }
 0x147   : > { %v943_v1 = vadd.f32 1e-06, %v894_v45  ;;  %v942_v24 = vadd.f32 1e-06, %v893_v55  ;;  %v3417_v45 = vld [vmem:[#allocation48_spill] sm:$0xff] }
 0x148   : > { %v721_v63 = vpop.xlane.xlu1 %720  ;;  %v717_v59 = vpop.xlane.xlu0 %716 }
 0x149   : > { %1551 = vrsqrt.f32 %v943_v1  ;;  %v896_v58 = vmul.f32 0.0052083335, %v721_v63  ;;  %v895_v27 = vmul.f32 0.0052083335, %v717_v59 }
 0x14a   : > { %1553 = vrsqrt.f32 %v942_v24 }
 0x14b   : > { %v1546_v3 = vpop.eup %1545  ;;  %v945_v40 = vadd.f32 1e-06, %v896_v58  ;;  %v944_v31 = vadd.f32 1e-06, %v895_v27 }
 0x14c   : > { %v1037_v32 = vmul.f32 %v1546_v3, %v3417_v45  ;;  %v1038_v55 = vmul.f32 %v1546_v3, %v3418_v48  ;;  %v729_v1 = vpop.xlane.xlu1 %728  ;;  %v725_v63 = vpop.xlane.xlu0 %724  ;;  %v3419_v3 = vld [vmem:[#allocation50_spill] sm:$0xff]  ;;  %v3420_v45 = vld [vmem:[#allocation51_spill] sm:$0xff] }
 0x14d   : > { %1555 = vrsqrt.f32 %v945_v40  ;;  %v898_v59 = vmul.f32 0.0052083335, %v729_v1  ;;  %v897_v9 = vmul.f32 0.0052083335, %v725_v63 }
 0x14e   : > { %v1154_v8 = vmul.f32 %v2667_v12, %v1037_v32  ;;  %v1155_v17 = vmul.f32 %v2669_v13, %v1038_v55  ;;  %1557 = vrsqrt.f32 %v944_v31 }
 0x14f   : > { %v1548_v58 = vpop.eup %1547  ;;  %v947_v39 = vadd.f32 1e-06, %v898_v59  ;;  %v946_v24 = vadd.f32 1e-06, %v897_v9 }
 0x150   : > { %v1550_v56 = vpop.eup %1549  ;;  %v1270_v43 = vadd.f32 %v2671_v50, %v1154_v8  ;;  %v1271_v27 = vadd.f32 %v2673_v49, %v1155_v17  ;;  %v1041_v40 = vmul.f32 %v1548_v58, %v3419_v3  ;;  %v1042_v31 = vmul.f32 %v1548_v58, %v3420_v45  ;;  %v737_v32 = vpop.xlane.xlu1 %736 }
 0x151   : > { %v733_v48 = vpop.xlane.xlu0 %732  ;;  %v1039_v55 = vmul.f32 %v1550_v56, %v2146_v41  ;;  %v1040_v1 = vmul.f32 %v1550_v56, %v2149_v4  ;;  %1559 = vrsqrt.f32 %v947_v39  ;;  %v900_v63 = vmul.f32 0.0052083335, %v737_v32 }
 0x152   : > { %1368 = vst [vmem:[%s2684_s20] sm:$0xff] %v1270_v43  ;;  %1369 = vst.msk [vmem:[%s2684_s20 + $0x8] sm:$0xff] %vm251_vm0, %v1271_v27  ;;  %v1158_v59 = vmul.f32 %v2667_v12, %v1041_v40  ;;  %v1159_v9 = vmul.f32 %v2669_v13, %v1042_v31  ;;  %1561 = vrsqrt.f32 %v946_v24  ;;  %v899_v8 = vmul.f32 0.0052083335, %v733_v48  ;;  %v3421_v48 = vld [vmem:[#allocation52_spill] sm:$0xff] }
 0x153   : > { %v1552_v17 = vpop.eup %1551  ;;  %v1156_v58 = vmul.f32 %v2667_v12, %v1039_v55  ;;  %v1157_v41 = vmul.f32 %v2669_v13, %v1040_v1  ;;  %v949_v3 = vadd.f32 1e-06, %v900_v63 }
 0x154   : > { %v1554_v4 = vpop.eup %1553  ;;  %v1274_v39 = vadd.f32 %v2671_v50, %v1158_v59  ;;  %v1275_v56 = vadd.f32 %v2673_v49, %v1159_v9  ;;  %v1045_v43 = vmul.f32 %v1552_v17, %v2168_v7  ;;  %v1046_v24 = vmul.f32 %v1552_v17, %v2171_v0  ;;  %v745_v27 = vpop.xlane.xlu1 %744 }
 0x155   : > { %v741_v40 = vpop.xlane.xlu0 %740  ;;  %v1272_v45 = vadd.f32 %v2671_v50, %v1156_v58  ;;  %v1273_v31 = vadd.f32 %v2673_v49, %v1157_v41  ;;  %v1043_v32 = vmul.f32 %v1554_v4, %v2153_v61  ;;  %v1044_v55 = vmul.f32 %v1554_v4, %v3421_v48 }
 0x156   : > { %1372 = vst [vmem:[%s2684_s20 + $0x20] sm:$0xff] %v1274_v39  ;;  %1373 = vst.msk [vmem:[%s2684_s20 + $0x28] sm:$0xff] %vm251_vm0, %v1275_v56  ;;  %v1162_v1 = vmul.f32 %v2667_v12, %v1045_v43  ;;  %v1163_v7 = vmul.f32 %v2669_v13, %v1046_v24  ;;  %1563 = vrsqrt.f32 %v949_v3  ;;  %v948_v63 = vadd.f32 1e-06, %v899_v8 }
 0x157   : > { %v1556_v0 = vpop.eup %1555  ;;  %1370 = vst [vmem:[%s2684_s20 + $0x10] sm:$0xff] %v1272_v45  ;;  %1371 = vst.msk [vmem:[%s2684_s20 + $0x18] sm:$0xff] %vm251_vm0, %v1273_v31  ;;  %v1160_v59 = vmul.f32 %v2667_v12, %v1043_v32  ;;  %v1161_v61 = vmul.f32 %v2669_v13, %v1044_v55  ;;  %v902_v9 = vmul.f32 0.0052083335, %v745_v27  ;;  %v901_v17 = vmul.f32 0.0052083335, %v741_v40 }
 0x158   : > { %v1558_v58 = vpop.eup %1557  ;;  %v1278_v41 = vadd.f32 %v2671_v50, %v1162_v1  ;;  %v1279_v4 = vadd.f32 %v2673_v49, %v1163_v7  ;;  %v1049_v8 = vmul.f32 %v1556_v0, %v2190_v6  ;;  %v1050_v3 = vmul.f32 %v1556_v0, %v2193_v51  ;;  %v753_v39 = vpop.xlane.xlu1 %752 }
 0x159   : > { %v749_v56 = vpop.xlane.xlu0 %748  ;;  %v1276_v43 = vadd.f32 %v2671_v50, %v1160_v59  ;;  %v1277_v24 = vadd.f32 %v2673_v49, %v1161_v61  ;;  %v1047_v27 = vmul.f32 %v1558_v58, %v2175_v19  ;;  %v1048_v40 = vmul.f32 %v1558_v58, %v2178_v57 }
 0x15a   : > { %1376 = vst [vmem:[%s2684_s20 + $0x40] sm:$0xff] %v1278_v41  ;;  %1377 = vst.msk [vmem:[%s2684_s20 + $0x48] sm:$0xff] %vm251_vm0, %v1279_v4  ;;  %v1166_v45 = vmul.f32 %v2667_v12, %v1049_v8  ;;  %v1167_v6 = vmul.f32 %v2669_v13, %v1050_v3  ;;  %1565 = vrsqrt.f32 %v948_v63  ;;  %v951_v31 = vadd.f32 1e-06, %v902_v9 }
 0x15b   : > { %v1560_v51 = vpop.eup %1559  ;;  %1374 = vst [vmem:[%s2684_s20 + $0x30] sm:$0xff] %v1276_v43  ;;  %1375 = vst.msk [vmem:[%s2684_s20 + $0x38] sm:$0xff] %vm251_vm0, %v1277_v24  ;;  %v1164_v32 = vmul.f32 %v2667_v12, %v1047_v27  ;;  %v1165_v19 = vmul.f32 %v2669_v13, %v1048_v40  ;;  %v950_v57 = vadd.f32 1e-06, %v901_v17  ;;  %v904_v48 = vmul.f32 0.0052083335, %v753_v39 }
 0x15c   : > { %v1562_v55 = vpop.eup %1561  ;;  %v1282_v1 = vadd.f32 %v2671_v50, %v1166_v45  ;;  %v1283_v7 = vadd.f32 %v2673_v49, %v1167_v6  ;;  %v1053_v63 = vmul.f32 %v1560_v51, %v2212_v14  ;;  %v1054_v0 = vmul.f32 %v1560_v51, %v2215_v53  ;;  %v761_v59 = vpop.xlane.xlu1 %760 }
 0x15d   : > { %v757_v61 = vpop.xlane.xlu0 %756  ;;  %v1280_v9 = vadd.f32 %v2671_v50, %v1164_v32  ;;  %v1281_v58 = vadd.f32 %v2673_v49, %v1165_v19  ;;  %v1051_v17 = vmul.f32 %v1562_v55, %v2197_v2  ;;  %v1052_v41 = vmul.f32 %v1562_v55, %v2200_v21 }
 0x15e   : > { %1380 = vst [vmem:[%s2684_s20 + $0x60] sm:$0xff] %v1282_v1  ;;  %1381 = vst.msk [vmem:[%s2684_s20 + $0x68] sm:$0xff] %vm251_vm0, %v1283_v7  ;;  %v1170_v4 = vmul.f32 %v2667_v12, %v1053_v63  ;;  %v1171_v8 = vmul.f32 %v2669_v13, %v1054_v0  ;;  %1567 = vrsqrt.f32 %v951_v31  ;;  %v953_v14 = vadd.f32 1e-06, %v904_v48 }
 0x15f   : > { %1378 = vst [vmem:[%s2684_s20 + $0x50] sm:$0xff] %v1280_v9  ;;  %1379 = vst.msk [vmem:[%s2684_s20 + $0x58] sm:$0xff] %vm251_vm0, %v1281_v58  ;;  %v1168_v53 = vmul.f32 %v2667_v12, %v1051_v17  ;;  %v1169_v2 = vmul.f32 %v2669_v13, %v1052_v41  ;;  %1569 = vrsqrt.f32 %v950_v57  ;;  %v903_v21 = vmul.f32 0.0052083335, %v749_v56 }
 0x160   : > { %v1564_v3 = vpop.eup %1563  ;;  %v1286_v39 = vadd.f32 %v2671_v50, %v1170_v4  ;;  %v1287_v43 = vadd.f32 %v2673_v49, %v1171_v8  ;;  %1571 = vrsqrt.f32 %v953_v14  ;;  %v906_v24 = vmul.f32 0.0052083335, %v761_v59  ;;  %v769_v27 = vpop.xlane.xlu1 %768 }
 0x161   : > { %v765_v40 = vpop.xlane.xlu0 %764  ;;  %v1284_v45 = vadd.f32 %v2671_v50, %v1168_v53  ;;  %v1285_v6 = vadd.f32 %v2673_v49, %v1169_v2  ;;  %v1057_v31 = vmul.f32 %v1564_v3, %v2234_v22  ;;  %v1058_v51 = vmul.f32 %v1564_v3, %v2237_v35 }
 0x162   : > { %1384 = vst [vmem:[%s2684_s20 + $0x80] sm:$0xff] %v1286_v39  ;;  %1385 = vst.msk [vmem:[%s2684_s20 + $0x88] sm:$0xff] %vm251_vm0, %v1287_v43  ;;  %v952_v56 = vadd.f32 1e-06, %v903_v21  ;;  %v955_v32 = vadd.f32 1e-06, %v906_v24 }
 0x163   : > { %v905_v19 = vmul.f32 0.0052083335, %v757_v61  ;;  %1382 = vst [vmem:[%s2684_s20 + $0x70] sm:$0xff] %v1284_v45  ;;  %1383 = vst.msk [vmem:[%s2684_s20 + $0x78] sm:$0xff] %vm251_vm0, %v1285_v6  ;;  %v1174_v57 = vmul.f32 %v2667_v12, %v1057_v31  ;;  %v1175_v48 = vmul.f32 %v2669_v13, %v1058_v51  ;;  %v908_v55 = vmul.f32 0.0052083335, %v769_v27 }
 0x164   : > { %v907_v1 = vmul.f32 0.0052083335, %v765_v40  ;;  %v1566_v22 = vpop.eup %1565  ;;  %1573 = vrsqrt.f32 %v952_v56  ;;  %v777_v7 = vpop.xlane.xlu1 %776 }
 0x165   : > { %v954_v35 = vadd.f32 1e-06, %v905_v19  ;;  %v773_v63 = vpop.xlane.xlu0 %772  ;;  %v1290_v0 = vadd.f32 %v2671_v50, %v1174_v57  ;;  %v1291_v59 = vadd.f32 %v2673_v49, %v1175_v48  ;;  %v1055_v61 = vmul.f32 %v1566_v22, %v2219_v11 }
 0x166   : > { %v1056_v9 = vmul.f32 %v1566_v22, %v2222_v20  ;;  %1575 = vrsqrt.f32 %v955_v32  ;;  %v957_v58 = vadd.f32 1e-06, %v908_v55  ;;  %v956_v17 = vadd.f32 1e-06, %v907_v1 }
 0x167   : > { %v910_v41 = vmul.f32 0.0052083335, %v777_v7  ;;  %1388 = vst [vmem:[%s2684_s20 + $0xa0] sm:$0xff] %v1290_v0  ;;  %1389 = vst.msk [vmem:[%s2684_s20 + $0xa8] sm:$0xff] %vm251_vm0, %v1291_v59  ;;  %v1172_v4 = vmul.f32 %v2667_v12, %v1055_v61  ;;  %1577 = vrsqrt.f32 %v954_v35  ;;  %v909_v14 = vmul.f32 0.0052083335, %v773_v63 }
 0x168   : > { %v1173_v8 = vmul.f32 %v2669_v13, %v1056_v9  ;;  %v1568_v53 = vpop.eup %1567  ;;  %1579 = vrsqrt.f32 %v957_v58  ;;  %v785_v2 = vpop.xlane.xlu1 %784 }
 0x169   : > { %v959_v11 = vadd.f32 1e-06, %v910_v41  ;;  %v781_v20 = vpop.xlane.xlu0 %780  ;;  %v1570_v21 = vpop.eup %1569  ;;  %v1288_v3 = vadd.f32 %v2671_v50, %v1172_v4  ;;  %v1061_v43 = vmul.f32 %v1568_v53, %v2256_v30  ;;  %v1062_v24 = vmul.f32 %v1568_v53, %v2259_v25 }
 0x16a   : > { %v1289_v39 = vadd.f32 %v2673_v49, %v1173_v8  ;;  %v1572_v27 = vpop.eup %1571  ;;  %v1059_v40 = vmul.f32 %v1570_v21, %v2241_v5  ;;  %v1060_v45 = vmul.f32 %v1570_v21, %v2244_v28  ;;  %1581 = vrsqrt.f32 %v956_v17 }
 0x16b   : > { %v958_v6 = vadd.f32 1e-06, %v909_v14  ;;  %1386 = vst [vmem:[%s2684_s20 + $0x90] sm:$0xff] %v1288_v3  ;;  %v1178_v31 = vmul.f32 %v2667_v12, %v1061_v43  ;;  %v1179_v51 = vmul.f32 %v2669_v13, %v1062_v24  ;;  %v1065_v56 = vmul.f32 %v1572_v27, %v2278_v38 }
 0x16c   : > { %1387 = vst.msk [vmem:[%s2684_s20 + $0x98] sm:$0xff] %vm251_vm0, %v1289_v39  ;;  %v1066_v30 = vmul.f32 %v1572_v27, %v2281_v29  ;;  %v1176_v25 = vmul.f32 %v2667_v12, %v1059_v40  ;;  %v1177_v5 = vmul.f32 %v2669_v13, %v1060_v45  ;;  %1583 = vrsqrt.f32 %v959_v11  ;;  %v793_v32 = vpop.xlane.xlu1 %792 }
 0x16d   : > { %v912_v28 = vmul.f32 0.0052083335, %v785_v2  ;;  %v789_v19 = vpop.xlane.xlu0 %788  ;;  %v1294_v57 = vadd.f32 %v2671_v50, %v1178_v31  ;;  %v1295_v48 = vadd.f32 %v2673_v49, %v1179_v51  ;;  %v1182_v38 = vmul.f32 %v2667_v12, %v1065_v56 }
 0x16e   : > { %v1183_v29 = vmul.f32 %v2669_v13, %v1066_v30  ;;  %v1574_v55 = vpop.eup %1573  ;;  %v1292_v1 = vadd.f32 %v2671_v50, %v1176_v25  ;;  %v1293_v22 = vadd.f32 %v2673_v49, %v1177_v5  ;;  %1585 = vrsqrt.f32 %v958_v6 }
 0x16f   : > { %v961_v35 = vadd.f32 1e-06, %v912_v28  ;;  %1392 = vst [vmem:[%s2684_s20 + $0xc0] sm:$0xff] %v1294_v57  ;;  %1393 = vst.msk [vmem:[%s2684_s20 + $0xc8] sm:$0xff] %vm251_vm0, %v1295_v48  ;;  %v1298_v7 = vadd.f32 %v2671_v50, %v1182_v38  ;;  %v1063_v0 = vmul.f32 %v1574_v55, %v2263_v18  ;;  %v1064_v59 = vmul.f32 %v1574_v55, %v2266_v36 }
 0x170   : > { %v1299_v63 = vadd.f32 %v2673_v49, %v1183_v29  ;;  %v1576_v61 = vpop.eup %1575  ;;  %1390 = vst [vmem:[%s2684_s20 + $0xb0] sm:$0xff] %v1292_v1  ;;  %1391 = vst.msk [vmem:[%s2684_s20 + $0xb8] sm:$0xff] %vm251_vm0, %v1293_v22  ;;  %v911_v9 = vmul.f32 0.0052083335, %v781_v20  ;;  %v914_v58 = vmul.f32 0.0052083335, %v793_v32  ;;  %v801_v41 = vpop.xlane.xlu1 %800 }
 0x171   : > { %1587 = vrsqrt.f32 %v961_v35  ;;  %v913_v17 = vmul.f32 0.0052083335, %v789_v19  ;;  %v2807_v4 = vpop.xlane.xlu0 %796  ;;  %v1578_v8 = vpop.eup %1577  ;;  %1396 = vst [vmem:[%s2684_s20 + $0xe0] sm:$0xff] %v1298_v7  ;;  %v1180_v14 = vmul.f32 %v2667_v12, %v1063_v0  ;;  %v1181_v18 = vmul.f32 %v2669_v13, %v1064_v59 }
 0x172   : > { %1397 = vst.msk [vmem:[%s2684_s20 + $0xe8] sm:$0xff] %vm251_vm0, %v1299_v63  ;;  %v1069_v36 = vmul.f32 %v1576_v61, %v2300_v46  ;;  %v1070_v53 = vmul.f32 %v1576_v61, %v2303_v10  ;;  %v1580_v11 = vpop.eup %1579  ;;  %v1067_v2 = vmul.f32 %v1578_v8, %v2285_v26  ;;  %v1068_v20 = vmul.f32 %v1578_v8, %v2288_v44 }
 0x173   : > { %v960_v21 = vadd.f32 1e-06, %v911_v9  ;;  %v963_v3 = vadd.f32 1e-06, %v914_v58  ;;  %v1296_v39 = vadd.f32 %v2671_v50, %v1180_v14  ;;  %v1297_v43 = vadd.f32 %v2673_v49, %v1181_v18 }
 0x174   : > { %v1186_v24 = vmul.f32 %v2667_v12, %v1069_v36  ;;  %v1187_v27 = vmul.f32 %v2669_v13, %v1070_v53  ;;  %v1582_v46 = vpop.eup %1581  ;;  %v1184_v10 = vmul.f32 %v2667_v12, %v1067_v2  ;;  %v1185_v40 = vmul.f32 %v2669_v13, %v1068_v20  ;;  %v809_v45 = vpop.xlane.xlu1 %808 }
 0x175   : > { %v1073_v26 = vmul.f32 %v1580_v11, %v2322_v54  ;;  %v1074_v44 = vmul.f32 %v1580_v11, %v2325_v37  ;;  %v805_v6 = vpop.xlane.xlu0 %804  ;;  %1394 = vst [vmem:[%s2684_s20 + $0xd0] sm:$0xff] %v1296_v39  ;;  %1395 = vst.msk [vmem:[%s2684_s20 + $0xd8] sm:$0xff] %vm251_vm0, %v1297_v43  ;;  %v1071_v56 = vmul.f32 %v1582_v46, %v2307_v34  ;;  %1589 = vrsqrt.f32 %v960_v21 }
 0x176   : > { %v1302_v31 = vadd.f32 %v2671_v50, %v1186_v24  ;;  %v1303_v51 = vadd.f32 %v2673_v49, %v1187_v27  ;;  %v1072_v30 = vmul.f32 %v1582_v46, %v2310_v52  ;;  %v1584_v25 = vpop.eup %1583  ;;  %v1300_v54 = vadd.f32 %v2671_v50, %v1184_v10 }
 0x177   : > { %v1301_v37 = vadd.f32 %v2673_v49, %v1185_v40  ;;  %v1190_v5 = vmul.f32 %v2667_v12, %v1073_v26  ;;  %v1191_v28 = vmul.f32 %v2669_v13, %v1074_v44  ;;  %v1188_v32 = vmul.f32 %v2667_v12, %v1071_v56 }
 0x178   : > { %1400 = vst [vmem:[%s2684_s20 + $0x100] sm:$0xff] %v1302_v31  ;;  %1401 = vst.msk [vmem:[%s2684_s20 + $0x108] sm:$0xff] %vm251_vm0, %v1303_v51  ;;  %v1189_v19 = vmul.f32 %v2669_v13, %v1072_v30  ;;  %v1077_v34 = vmul.f32 %v1584_v25, %v2344_v62  ;;  %v1078_v52 = vmul.f32 %v1584_v25, %v2347_v15  ;;  %v1586_v57 = vpop.eup %1585  ;;  %v962_v29 = vadd.f32 1e-06, %v913_v17  ;;  %v817_v55 = vpop.xlane.xlu1 %816  ;;  %v3422_v51 = vld [vmem:[#allocation53_spill] sm:$0xff]  ;;  %v3423_v30 = vld [vmem:[#allocation54_spill] sm:$0xff] }
 0x179   : > { %1398 = vst [vmem:[%s2684_s20 + $0xf0] sm:$0xff] %v1300_v54  ;;  %1399 = vst.msk [vmem:[%s2684_s20 + $0xf8] sm:$0xff] %vm251_vm0, %v1301_v37  ;;  %v1306_v48 = vadd.f32 %v2671_v50, %v1190_v5  ;;  %v1307_v38 = vadd.f32 %v2673_v49, %v1191_v28  ;;  %v813_v1 = vpop.xlane.xlu0 %812  ;;  %v1304_v62 = vadd.f32 %v2671_v50, %v1188_v32  ;;  %1591 = vrsqrt.f32 %v963_v3 }
 0x17a   : > { %v1305_v22 = vadd.f32 %v2673_v49, %v1189_v19  ;;  %v1194_v15 = vmul.f32 %v2667_v12, %v1077_v34  ;;  %v1195_v35 = vmul.f32 %v2669_v13, %v1078_v52  ;;  %v1075_v63 = vmul.f32 %v1586_v57, %v2329_v42 }
 0x17b   : > { %v1588_v7 = vpop.eup %1587  ;;  %1404 = vst [vmem:[%s2684_s20 + $0x120] sm:$0xff] %v1306_v48  ;;  %1405 = vst.msk [vmem:[%s2684_s20 + $0x128] sm:$0xff] %vm251_vm0, %v1307_v38  ;;  %v1076_v0 = vmul.f32 %v1586_v57, %v2332_v60  ;;  %v916_v59 = vmul.f32 0.0052083335, %v801_v41  ;;  %1593 = vrsqrt.f32 %v962_v29  ;;  %v917_v2 = vmul.f32 0.0052083335, %v805_v6 }
 0x17c   : > { %1402 = vst [vmem:[%s2684_s20 + $0x110] sm:$0xff] %v1304_v62  ;;  %1403 = vst.msk [vmem:[%s2684_s20 + $0x118] sm:$0xff] %vm251_vm0, %v1305_v22  ;;  %v1310_v61 = vadd.f32 %v2671_v50, %v1194_v15  ;;  %v1311_v9 = vadd.f32 %v2673_v49, %v1195_v35  ;;  %v1081_v58 = vmul.f32 %v1588_v7, %v2366_v16  ;;  %v825_v14 = vpop.xlane.xlu1 %824  ;;  %v915_v16 = vmul.f32 0.0052083335, %v2807_v4  ;;  %v3424_v57 = vld [vmem:[#allocation4_spill] sm:$0xff]  ;;  %v3425_v38 = vld [vmem:[#allocation2_spill] sm:$0xff] }
 0x17d   : > { %v1082_v17 = vmul.f32 %v1588_v7, %v2369_v23  ;;  %v1192_v8 = vmul.f32 %v2667_v12, %v1075_v63  ;;  %v1193_v42 = vmul.f32 %v2669_v13, %v1076_v0  ;;  %v965_v60 = vadd.f32 1e-06, %v916_v59  ;;  %v821_v41 = vpop.xlane.xlu0 %820  ;;  %v3426_v59 = vld [vmem:[#allocation55_spill] sm:$0xff] }
 0x17e   : > { %1408 = vst [vmem:[%s2684_s20 + $0x140] sm:$0xff] %v1310_v61  ;;  %1409 = vst.msk [vmem:[%s2684_s20 + $0x148] sm:$0xff] %vm251_vm0, %v1311_v9  ;;  %v1198_v18 = vmul.f32 %v2667_v12, %v1081_v58  ;;  %v918_v23 = vmul.f32 0.0052083335, %v809_v45  ;;  %v964_v3 = vadd.f32 1e-06, %v915_v16 }
 0x17f   : > { %v1199_v36 = vmul.f32 %v2669_v13, %v1082_v17  ;;  %v1308_v53 = vadd.f32 %v2671_v50, %v1192_v8  ;;  %v1309_v11 = vadd.f32 %v2673_v49, %v1193_v42  ;;  %1595 = vrsqrt.f32 %v965_v60  ;;  %v1590_v44 = vpop.eup %1589  ;;  %v3427_v9 = vld [vmem:[#allocation56_spill] sm:$0xff] }
 0x180   : > { %v1314_v20 = vadd.f32 %v2671_v50, %v1198_v18  ;;  %v967_v39 = vadd.f32 1e-06, %v918_v23  ;;  %v966_v43 = vadd.f32 1e-06, %v917_v2  ;;  %v920_v4 = vmul.f32 0.0052083335, %v817_v55  ;;  %v833_v27 = vpop.xlane.xlu1 %832 }
 0x181   : > { %v1315_v21 = vadd.f32 %v2673_v49, %v1199_v36  ;;  %1406 = vst [vmem:[%s2684_s20 + $0x130] sm:$0xff] %v1308_v53  ;;  %1407 = vst.msk [vmem:[%s2684_s20 + $0x138] sm:$0xff] %vm251_vm0, %v1309_v11  ;;  %v919_v24 = vmul.f32 0.0052083335, %v813_v1  ;;  %v829_v46 = vpop.xlane.xlu0 %828  ;;  %1597 = vrsqrt.f32 %v964_v3  ;;  %v922_v10 = vmul.f32 0.0052083335, %v825_v14 }
 0x182   : > { %1412 = vst [vmem:[%s2684_s20 + $0x160] sm:$0xff] %v1314_v20  ;;  %v921_v40 = vmul.f32 0.0052083335, %v821_v41  ;;  %v924_v26 = vmul.f32 0.0052083335, %v833_v27  ;;  %1599 = vrsqrt.f32 %v967_v39  ;;  %v1079_v56 = vmul.f32 %v1590_v44, %v3422_v51  ;;  %v3428_v41 = vld [vmem:[#allocation8_spill] sm:$0xff] }
 0x183   : > { %1413 = vst.msk [vmem:[%s2684_s20 + $0x168] sm:$0xff] %vm251_vm0, %v1315_v21  ;;  %v969_v45 = vadd.f32 1e-06, %v920_v4  ;;  %v968_v6 = vadd.f32 1e-06, %v919_v24  ;;  %v1080_v25 = vmul.f32 %v1590_v44, %v3423_v30  ;;  %1601 = vrsqrt.f32 %v966_v43  ;;  %v1592_v54 = vpop.eup %1591  ;;  %v3429_v36 = vld [vmem:[#allocation6_spill] sm:$0xff] }
 0x184   : > { %v923_v31 = vmul.f32 0.0052083335, %v829_v46  ;;  %v971_v37 = vadd.f32 1e-06, %v922_v10  ;;  %v970_v5 = vadd.f32 1e-06, %v921_v40  ;;  %v841_v32 = vpop.xlane.xlu1 %840  ;;  %v1196_v34 = vmul.f32 %v2667_v12, %v1079_v56 }
 0x185   : > { %1603 = vrsqrt.f32 %v969_v45  ;;  %v973_v28 = vadd.f32 1e-06, %v924_v26  ;;  %v837_v19 = vpop.xlane.xlu0 %836  ;;  %v1197_v52 = vmul.f32 %v2669_v13, %v1080_v25  ;;  %v1085_v48 = vmul.f32 %v1592_v54, %v3424_v57  ;;  %v1594_v55 = vpop.eup %1593  ;;  %v3430_v24 = vld [vmem:[#allocation5_spill] sm:$0xff]  ;;  %v3431_v46 = vld [vmem:[#allocation3_spill] sm:$0xff]  ;;  %v3433_v56 = vld [vmem:[#allocation10_spill] sm:$0xff] }
 0x186   : > { %v1086_v29 = vmul.f32 %v1592_v54, %v3425_v38  ;;  %1605 = vrsqrt.f32 %v968_v6  ;;  %v2889_v1 = vadd.f32 1e-06, %v923_v31  ;;  %v926_v62 = vmul.f32 0.0052083335, %v841_v32  ;;  %v3432_v31 = vld [vmem:[#allocation12_spill] sm:$0xff]  ;;  %v3435_v32 = vld [vmem:[#allocation7_spill] sm:$0xff] }
 0x187   : > { %v925_v22 = vmul.f32 0.0052083335, %v837_v19  ;;  %v1312_v15 = vadd.f32 %v2671_v50, %v1196_v34  ;;  %v1313_v35 = vadd.f32 %v2673_v49, %v1197_v52  ;;  %v1202_v7 = vmul.f32 %v2667_v12, %v1085_v48  ;;  %v3436_v57 = vld [vmem:[#allocation16_spill] sm:$0xff]  ;;  %v3437_v38 = vld [vmem:[#allocation14_spill] sm:$0xff] }
 0x188   : > { %v1203_v63 = vmul.f32 %v2669_v13, %v1086_v29  ;;  %v1083_v61 = vmul.f32 %v1594_v55, %v3426_v59  ;;  %v1084_v58 = vmul.f32 %v1594_v55, %v3427_v9  ;;  %1607 = vrsqrt.f32 %v971_v37  ;;  %v849_v8 = vpop.xlane.xlu1 %848 }
 0x189   : > { %v1596_v0 = vpop.eup %1595  ;;  %v2897_v17 = vadd.f32 1e-06, %v926_v62  ;;  %v2899_v42 = vpop.xlane.xlu0 %844  ;;  %1410 = vst [vmem:[%s2684_s20 + $0x150] sm:$0xff] %v1312_v15  ;;  %1411 = vst.msk [vmem:[%s2684_s20 + $0x158] sm:$0xff] %vm251_vm0, %v1313_v35  ;;  %v1318_v60 = vadd.f32 %v2671_v50, %v1202_v7  ;;  %1609 = vrsqrt.f32 %v970_v5  ;;  %v2910_v11 = vadd.f32 1e-06, %v925_v22 }
 0x18a   : > { %v1319_v14 = vadd.f32 %v2673_v49, %v1203_v63  ;;  %v1089_v18 = vmul.f32 %v1596_v0, %v3428_v41  ;;  %v1090_v16 = vmul.f32 %v1596_v0, %v3429_v36  ;;  %v1200_v23 = vmul.f32 %v2667_v12, %v1083_v61  ;;  %v3434_v5 = vld [vmem:[#allocation9_spill] sm:$0xff] }
 0x18b   : > { %v1201_v53 = vmul.f32 %v2669_v13, %v1084_v58  ;;  %v1598_v2 = vpop.eup %1597  ;;  %1416 = vst [vmem:[%s2684_s20 + $0x180] sm:$0xff] %v1318_v60  ;;  %1611 = vrsqrt.f32 %v973_v28  ;;  %v928_v3 = vmul.f32 0.0052083335, %v849_v8 }
 0x18c   : > { %1417 = vst.msk [vmem:[%s2684_s20 + $0x188] sm:$0xff] %vm251_vm0, %v1319_v14  ;;  %v1206_v20 = vmul.f32 %v2667_v12, %v1089_v18  ;;  %v1207_v21 = vmul.f32 %v2669_v13, %v1090_v16  ;;  %v1600_v39 = vpop.eup %1599  ;;  %v1316_v43 = vadd.f32 %v2671_v50, %v1200_v23  ;;  %v1087_v27 = vmul.f32 %v1598_v2, %v3430_v24  ;;  %v2921_v40 = vpop.xlane.xlu1 %856  ;;  %v3438_v14 = vld [vmem:[#allocation13_spill] sm:$0xff]  ;;  %v3439_v18 = vld [vmem:[#allocation11_spill] sm:$0xff] }
 0x18d   : > { %v1317_v4 = vadd.f32 %v2673_v49, %v1201_v53  ;;  %v1088_v10 = vmul.f32 %v1598_v2, %v3431_v46  ;;  %v2923_v26 = vpop.xlane.xlu0 %852  ;;  %v1602_v44 = vpop.eup %1601  ;;  %v1093_v51 = vmul.f32 %v1600_v39, %v3432_v31  ;;  %v1094_v30 = vmul.f32 %v1600_v39, %v3433_v56  ;;  %v3440_v53 = vld [vmem:[#allocation20_spill] sm:$0xff] }
 0x18e   : > { %v1322_v45 = vadd.f32 %v2671_v50, %v1206_v20  ;;  %v1323_v6 = vadd.f32 %v2673_v49, %v1207_v21  ;;  %1414 = vst [vmem:[%s2684_s20 + $0x170] sm:$0xff] %v1316_v43  ;;  %v1204_v54 = vmul.f32 %v2667_v12, %v1087_v27  ;;  %v1091_v28 = vmul.f32 %v1602_v44, %v3434_v5  ;;  %v3441_v20 = vld [vmem:[#allocation18_spill] sm:$0xff] }
 0x18f   : > { %v1604_v25 = vpop.eup %1603  ;;  %1415 = vst.msk [vmem:[%s2684_s20 + $0x178] sm:$0xff] %vm251_vm0, %v1317_v4  ;;  %v1205_v37 = vmul.f32 %v2669_v13, %v1088_v10  ;;  %v1092_v19 = vmul.f32 %v1602_v44, %v3435_v32  ;;  %v1210_v34 = vmul.f32 %v2667_v12, %v1093_v51  ;;  %v1211_v52 = vmul.f32 %v2669_v13, %v1094_v30  ;;  %v3443_v51 = vld [vmem:[#allocation15_spill] sm:$0xff]  ;;  %v3444_v30 = vld [vmem:[#allocation24_spill] sm:$0xff] }
 0x190   : > { %1420 = vst [vmem:[%s2684_s20 + $0x1a0] sm:$0xff] %v1322_v45  ;;  %1421 = vst.msk [vmem:[%s2684_s20 + $0x1a8] sm:$0xff] %vm251_vm0, %v1323_v6  ;;  %v1097_v48 = vmul.f32 %v1604_v25, %v3436_v57  ;;  %v1098_v29 = vmul.f32 %v1604_v25, %v3437_v38  ;;  %v1606_v55 = vpop.eup %1605  ;;  %v1320_v62 = vadd.f32 %v2671_v50, %v1204_v54  ;;  %v2947_v7 = vpop.xlane.xlu1 %864  ;;  %1613 = vrsqrt.f32 %v2889_v1  ;;  %v3442_v6 = vld [vmem:[#allocation17_spill] sm:$0xff]  ;;  %v3445_v54 = vld [vmem:[#allocation22_spill] sm:$0xff] }
 0x191   : > { %v1321_v22 = vadd.f32 %v2673_v49, %v1205_v37  ;;  %v1208_v15 = vmul.f32 %v2667_v12, %v1091_v28  ;;  %v1209_v35 = vmul.f32 %v2669_v13, %v1092_v19  ;;  %v2949_v63 = vpop.xlane.xlu0 %860  ;;  %v1326_v0 = vadd.f32 %v2671_v50, %v1210_v34 }
 0x192   : > { %v1327_v59 = vadd.f32 %v2673_v49, %v1211_v52  ;;  %v1214_v61 = vmul.f32 %v2667_v12, %v1097_v48  ;;  %v1215_v9 = vmul.f32 %v2669_v13, %v1098_v29  ;;  %v1608_v58 = vpop.eup %1607  ;;  %1418 = vst [vmem:[%s2684_s20 + $0x190] sm:$0xff] %v1320_v62  ;;  %v1095_v41 = vmul.f32 %v1606_v55, %v3438_v14 }
 0x193   : > { %1419 = vst.msk [vmem:[%s2684_s20 + $0x198] sm:$0xff] %vm251_vm0, %v1321_v22  ;;  %v1324_v8 = vadd.f32 %v2671_v50, %v1208_v15  ;;  %v1325_v60 = vadd.f32 %v2673_v49, %v1209_v35  ;;  %v1096_v36 = vmul.f32 %v1606_v55, %v3439_v18  ;;  %1424 = vst [vmem:[%s2684_s20 + $0x1c0] sm:$0xff] %v1326_v0  ;;  %v1610_v39 = vpop.eup %1609  ;;  %v977_v24 = vadd.f32 1e-06, %v928_v3  ;;  %v3446_v18 = vld [vmem:[#allocation21_spill] sm:$0xff] }
 0x194   : > { %1425 = vst.msk [vmem:[%s2684_s20 + $0x1c8] sm:$0xff] %vm251_vm0, %v1327_v59  ;;  %v1330_v16 = vadd.f32 %v2671_v50, %v1214_v61  ;;  %v1331_v23 = vadd.f32 %v2673_v49, %v1215_v9  ;;  %v1101_v2 = vmul.f32 %v1608_v58, %v3440_v53  ;;  %v1102_v21 = vmul.f32 %v1608_v58, %v3441_v20  ;;  %v873_v27 = vpop.xlane.xlu1 %872 }
 0x195   : > { %1422 = vst [vmem:[%s2684_s20 + $0x1b0] sm:$0xff] %v1324_v8  ;;  %1423 = vst.msk [vmem:[%s2684_s20 + $0x1b8] sm:$0xff] %vm251_vm0, %v1325_v60  ;;  %v1212_v43 = vmul.f32 %v2667_v12, %v1095_v41  ;;  %v1213_v4 = vmul.f32 %v2669_v13, %v1096_v36  ;;  %v869_v46 = vpop.xlane.xlu0 %868  ;;  %v1612_v10 = vpop.eup %1611  ;;  %v1099_v31 = vmul.f32 %v1610_v39, %v3442_v6  ;;  %1615 = vrsqrt.f32 %v2897_v17  ;;  %v3447_v36 = vld [vmem:[#allocation19_spill] sm:$0xff] }
 0x196   : > { %1428 = vst [vmem:[%s2684_s20 + $0x1e0] sm:$0xff] %v1330_v16  ;;  %1429 = vst.msk [vmem:[%s2684_s20 + $0x1e8] sm:$0xff] %vm251_vm0, %v1331_v23  ;;  %v1218_v44 = vmul.f32 %v2667_v12, %v1101_v2  ;;  %v1219_v45 = vmul.f32 %v2669_v13, %v1102_v21  ;;  %v1100_v56 = vmul.f32 %v1610_v39, %v3443_v51  ;;  %v927_v57 = vmul.f32 0.0052083335, %v2899_v42  ;;  %v3450_v51 = vld [vmem:[#allocation25_spill] sm:$0xff] }
 0x197   : > { %v1328_v1 = vadd.f32 %v2671_v50, %v1212_v43  ;;  %v1329_v3 = vadd.f32 %v2673_v49, %v1213_v4  ;;  %v1105_v25 = vmul.f32 %v1612_v10, %v3444_v30  ;;  %v1106_v37 = vmul.f32 %v1612_v10, %v3445_v54  ;;  %v3448_v10 = vld [vmem:[#allocation28_spill] sm:$0xff] }
 0x198   : > { %v1334_v5 = vadd.f32 %v2671_v50, %v1218_v44  ;;  %v1335_v28 = vadd.f32 %v2673_v49, %v1219_v45  ;;  %v1216_v32 = vmul.f32 %v2667_v12, %v1099_v31  ;;  %v1217_v19 = vmul.f32 %v2669_v13, %v1100_v56  ;;  %v881_v48 = vpop.xlane.xlu1 %880  ;;  %v3449_v45 = vld [vmem:[#allocation26_spill] sm:$0xff] }
 0x199   : > { %1426 = vst [vmem:[%s2684_s20 + $0x1d0] sm:$0xff] %v1328_v1  ;;  %1427 = vst.msk [vmem:[%s2684_s20 + $0x1d8] sm:$0xff] %vm251_vm0, %v1329_v3  ;;  %v1222_v34 = vmul.f32 %v2667_v12, %v1105_v25  ;;  %v1223_v52 = vmul.f32 %v2669_v13, %v1106_v37  ;;  %1617 = vrsqrt.f32 %v2910_v11  ;;  %v930_v55 = vmul.f32 0.0052083335, %v2921_v40  ;;  %v877_v62 = vpop.xlane.xlu0 %876  ;;  %v3451_v1 = vld [vmem:[#allocation23_spill] sm:$0xff]  ;;  %v3452_v37 = vld [vmem:[#allocation32_spill] sm:$0xff] }
 0x19a   : > { %1432 = vst [vmem:[%s2684_s20 + $0x200] sm:$0xff] %v1334_v5  ;;  %1433 = vst.msk [vmem:[%s2684_s20 + $0x208] sm:$0xff] %vm251_vm0, %v1335_v28  ;;  %v1332_v38 = vadd.f32 %v2671_v50, %v1216_v32  ;;  %v1333_v29 = vadd.f32 %v2673_v49, %v1217_v19  ;;  %1619 = vrsqrt.f32 %v977_v24  ;;  %v976_v42 = vadd.f32 1e-06, %v927_v57  ;;  %v1614_v8 = vpop.eup %1613  ;;  %v3453_v28 = vld [vmem:[#allocation30_spill] sm:$0xff] }
 0x19b   : > { %v1338_v22 = vadd.f32 %v2671_v50, %v1222_v34  ;;  %v1339_v17 = vadd.f32 %v2673_v49, %v1223_v52  ;;  %v979_v15 = vadd.f32 1e-06, %v930_v55  ;;  %v929_v35 = vmul.f32 0.0052083335, %v2923_v26 }
 0x19c   : > { %1430 = vst [vmem:[%s2684_s20 + $0x1f0] sm:$0xff] %v1332_v38  ;;  %1431 = vst.msk [vmem:[%s2684_s20 + $0x1f8] sm:$0xff] %vm251_vm0, %v1333_v29  ;;  %v932_v0 = vmul.f32 0.0052083335, %v2947_v7  ;;  %1621 = vrsqrt.f32 %v976_v42  ;;  %v931_v11 = vmul.f32 0.0052083335, %v2949_v63  ;;  %v889_v58 = vpop.xlane.xlu1 %888  ;;  %v1103_v26 = vmul.f32 %v1614_v8, %v3446_v18 }
 0x19d   : > { %1436 = vst [vmem:[%s2684_s20 + $0x220] sm:$0xff] %v1338_v22  ;;  %1437 = vst.msk [vmem:[%s2684_s20 + $0x228] sm:$0xff] %vm251_vm0, %v1339_v17  ;;  %v934_v40 = vmul.f32 0.0052083335, %v873_v27  ;;  %v933_v59 = vmul.f32 0.0052083335, %v869_v46  ;;  %1623 = vrsqrt.f32 %v979_v15  ;;  %v1104_v7 = vmul.f32 %v1614_v8, %v3447_v36  ;;  %v885_v16 = vpop.xlane.xlu0 %884 }
 0x19e   : > { %v978_v61 = vadd.f32 1e-06, %v929_v35  ;;  %v981_v9 = vadd.f32 1e-06, %v932_v0  ;;  %v980_v60 = vadd.f32 1e-06, %v931_v11  ;;  %v1220_v2 = vmul.f32 %v2667_v12, %v1103_v26 }
 0x19f   : > { %v983_v14 = vadd.f32 1e-06, %v934_v40  ;;  %v936_v41 = vmul.f32 0.0052083335, %v881_v48  ;;  %v982_v23 = vadd.f32 1e-06, %v933_v59  ;;  %v1221_v20 = vmul.f32 %v2669_v13, %v1104_v7  ;;  %v1616_v21 = vpop.eup %1615 }
 0x1a0   : > { %1625 = vrsqrt.f32 %v978_v61  ;;  %v935_v53 = vmul.f32 0.0052083335, %v877_v62  ;;  %v938_v63 = vmul.f32 0.0052083335, %v889_v58  ;;  %v937_v4 = vmul.f32 0.0052083335, %v885_v16 }
 0x1a1   : > { %1627 = vrsqrt.f32 %v981_v9  ;;  %v985_v39 = vadd.f32 1e-06, %v936_v41  ;;  %v1336_v27 = vadd.f32 %v2671_v50, %v1220_v2  ;;  %v1337_v46 = vadd.f32 %v2673_v49, %v1221_v20  ;;  %v3454_v42 = vld [vmem:[#allocation29_spill] sm:$0xff]  ;;  %v3455_v35 = vld [vmem:[#allocation27_spill] sm:$0xff]  ;;  %v3456_v61 = vld [vmem:[#allocation36_spill] sm:$0xff] }
 0x1a2   : > { %1629 = vrsqrt.f32 %v980_v60  ;;  %v3019_v43 = vadd.f32 1e-06, %v935_v53  ;;  %v1109_v44 = vmul.f32 %v1616_v21, %v3448_v10  ;;  %v1110_v6 = vmul.f32 %v1616_v21, %v3449_v45  ;;  %v3457_v58 = vld [vmem:[#allocation34_spill] sm:$0xff]  ;;  %v3458_v18 = vld [vmem:[#allocation33_spill] sm:$0xff]  ;;  %v3459_v36 = vld [vmem:[#allocation31_spill] sm:$0xff] }
 0x1a3   : > { %1631 = vrsqrt.f32 %v983_v14  ;;  %v1618_v24 = vpop.eup %1617  ;;  %v3027_v30 = vadd.f32 1e-06, %v938_v63  ;;  %1434 = vst [vmem:[%s2684_s20 + $0x210] sm:$0xff] %v1336_v27  ;;  %1435 = vst.msk [vmem:[%s2684_s20 + $0x218] sm:$0xff] %vm251_vm0, %v1337_v46  ;;  %v3038_v57 = vadd.f32 1e-06, %v937_v4 }
 0x1a4   : > { %v1620_v31 = vpop.eup %1619  ;;  %v1107_v56 = vmul.f32 %v1618_v24, %v3450_v51  ;;  %v1108_v3 = vmul.f32 %v1618_v24, %v3451_v1  ;;  %1633 = vrsqrt.f32 %v982_v23  ;;  %v1226_v25 = vmul.f32 %v2667_v12, %v1109_v44  ;;  %v3460_v63 = vld [vmem:[#allocation40_spill] sm:$0xff]  ;;  %v3461_v20 = vld [vmem:[#allocation38_spill] sm:$0xff]  ;;  %v3462_v1 = vld [vmem:[#allocation37_spill] sm:$0xff] }
 0x1a5   : > { %v1227_v54 = vmul.f32 %v2669_v13, %v1110_v6  ;;  %v1113_v5 = vmul.f32 %v1620_v31, %v3452_v37  ;;  %v1114_v32 = vmul.f32 %v1620_v31, %v3453_v28  ;;  %1635 = vrsqrt.f32 %v985_v39 }
 0x1a6   : > { %v1622_v19 = vpop.eup %1621  ;;  %v1224_v34 = vmul.f32 %v2667_v12, %v1107_v56  ;;  %v1225_v52 = vmul.f32 %v2669_v13, %v1108_v3  ;;  %v1342_v38 = vadd.f32 %v2671_v50, %v1226_v25  ;;  %v3463_v25 = vld [vmem:[#allocation35_spill] sm:$0xff]  ;;  %1637 = vrsqrt.f32 %v3019_v43  ;;  %v3468_v43 = vld [vmem:[#allocation44_spill] sm:$0xff] }
 0x1a7   : > { %v1624_v48 = vpop.eup %1623  ;;  %v1343_v29 = vadd.f32 %v2673_v49, %v1227_v54  ;;  %v1230_v55 = vmul.f32 %v2667_v12, %v1113_v5  ;;  %v1231_v62 = vmul.f32 %v2669_v13, %v1114_v32  ;;  %v1111_v15 = vmul.f32 %v1622_v19, %v3454_v42 }
 0x1a8   : > { %v1340_v22 = vadd.f32 %v2671_v50, %v1224_v34  ;;  %v1341_v17 = vadd.f32 %v2673_v49, %v1225_v52  ;;  %v1112_v0 = vmul.f32 %v1622_v19, %v3455_v35  ;;  %1440 = vst [vmem:[%s2684_s20 + $0x240] sm:$0xff] %v1342_v38  ;;  %v1117_v9 = vmul.f32 %v1624_v48, %v3456_v61 }
 0x1a9   : > { %1441 = vst.msk [vmem:[%s2684_s20 + $0x248] sm:$0xff] %vm251_vm0, %v1343_v29  ;;  %v1346_v40 = vadd.f32 %v2671_v50, %v1230_v55  ;;  %v1347_v59 = vadd.f32 %v2673_v49, %v1231_v62  ;;  %v1118_v8 = vmul.f32 %v1624_v48, %v3457_v58  ;;  %v1228_v14 = vmul.f32 %v2667_v12, %v1111_v15  ;;  %v3464_v48 = vld [vmem:[#allocation41_spill] sm:$0xff]  ;;  %v3465_v29 = vld [vmem:[#allocation39_spill] sm:$0xff] }
 0x1aa   : > { %v1626_v11 = vpop.eup %1625  ;;  %1438 = vst [vmem:[%s2684_s20 + $0x230] sm:$0xff] %v1340_v22  ;;  %1439 = vst.msk [vmem:[%s2684_s20 + $0x238] sm:$0xff] %vm251_vm0, %v1341_v17  ;;  %v1229_v41 = vmul.f32 %v2669_v13, %v1112_v0  ;;  %v1234_v23 = vmul.f32 %v2667_v12, %v1117_v9  ;;  %v3466_v62 = vld [vmem:[#allocation45_spill] sm:$0xff]  ;;  %v3467_v17 = vld [vmem:[#allocation43_spill] sm:$0xff]  ;;  %1639 = vrsqrt.f32 %v3027_v30 }
 0x1ab   : > { %v1628_v60 = vpop.eup %1627  ;;  %v1115_v26 = vmul.f32 %v1626_v11, %v3458_v18  ;;  %v1116_v7 = vmul.f32 %v1626_v11, %v3459_v36  ;;  %1444 = vst [vmem:[%s2684_s20 + $0x260] sm:$0xff] %v1346_v40  ;;  %1445 = vst.msk [vmem:[%s2684_s20 + $0x268] sm:$0xff] %vm251_vm0, %v1347_v59  ;;  %v1235_v53 = vmul.f32 %v2669_v13, %v1118_v8  ;;  %1641 = vrsqrt.f32 %v3038_v57  ;;  %v3469_v36 = vld [vmem:[#allocation42_spill] sm:$0xff] }
 0x1ac   : > { %v1630_v16 = vpop.eup %1629  ;;  %v1121_v2 = vmul.f32 %v1628_v60, %v3460_v63  ;;  %v1122_v21 = vmul.f32 %v1628_v60, %v3461_v20  ;;  %v1344_v4 = vadd.f32 %v2671_v50, %v1228_v14  ;;  %v1345_v24 = vadd.f32 %v2673_v49, %v1229_v41  ;;  %v3471_v30 = vld [vmem:[#allocation58_spill] sm:$0xff] }
 0x1ad   : > { %v1632_v39 = vpop.eup %1631  ;;  %v1232_v27 = vmul.f32 %v2667_v12, %v1115_v26  ;;  %v1233_v46 = vmul.f32 %v2669_v13, %v1116_v7  ;;  %v1350_v10 = vadd.f32 %v2671_v50, %v1234_v23  ;;  %v1351_v44 = vadd.f32 %v2673_v49, %v1235_v53  ;;  %v3470_v23 = vld [vmem:[#allocation57_spill] sm:$0xff]  ;;  %v3472_v20 = vld [vmem:[#allocation46_spill] sm:$0xff] }
 0x1ae   : > { %v1238_v45 = vmul.f32 %v2667_v12, %v1121_v2  ;;  %v1239_v6 = vmul.f32 %v2669_v13, %v1122_v21  ;;  %v1634_v31 = vpop.eup %1633  ;;  %1442 = vst [vmem:[%s2684_s20 + $0x250] sm:$0xff] %v1344_v4  ;;  %1443 = vst.msk [vmem:[%s2684_s20 + $0x258] sm:$0xff] %vm251_vm0, %v1345_v24  ;;  %v1119_v3 = vmul.f32 %v1630_v16, %v3462_v1 }
 0x1af   : > { %v1348_v51 = vadd.f32 %v2671_v50, %v1232_v27  ;;  %v1349_v56 = vadd.f32 %v2673_v49, %v1233_v46  ;;  %v1120_v54 = vmul.f32 %v1630_v16, %v3463_v25  ;;  %1448 = vst [vmem:[%s2684_s20 + $0x280] sm:$0xff] %v1350_v10  ;;  %1449 = vst.msk [vmem:[%s2684_s20 + $0x288] sm:$0xff] %vm251_vm0, %v1351_v44  ;;  %v1636_v19 = vpop.eup %1635 }
 0x1b0   : > { %v1354_v37 = vadd.f32 %v2671_v50, %v1238_v45  ;;  %v1355_v5 = vadd.f32 %v2673_v49, %v1239_v6  ;;  %v1125_v28 = vmul.f32 %v1632_v39, %v2608_v47  ;;  %v1126_v32 = vmul.f32 %v1632_v39, %v2611_v33  ;;  %v1638_v41 = vpop.eup %1637  ;;  %v3473_v39 = vld [vmem:[#allocation47_spill] sm:$0xff] }
 0x1b1   : > { %1446 = vst [vmem:[%s2684_s20 + $0x270] sm:$0xff] %v1348_v51  ;;  %1447 = vst.msk [vmem:[%s2684_s20 + $0x278] sm:$0xff] %vm251_vm0, %v1349_v56  ;;  %v1236_v34 = vmul.f32 %v2667_v12, %v1119_v3  ;;  %v1237_v52 = vmul.f32 %v2669_v13, %v1120_v54  ;;  %v1123_v38 = vmul.f32 %v1634_v31, %v3464_v48 }
 0x1b2   : > { %v1124_v55 = vmul.f32 %v1634_v31, %v3465_v29  ;;  %1452 = vst [vmem:[%s2684_s20 + $0x2a0] sm:$0xff] %v1354_v37  ;;  %1453 = vst.msk [vmem:[%s2684_s20 + $0x2a8] sm:$0xff] %vm251_vm0, %v1355_v5  ;;  %v1242_v47 = vmul.f32 %v2667_v12, %v1125_v28  ;;  %v1243_v33 = vmul.f32 %v2669_v13, %v1126_v32 }
 0x1b3   : > { %v1129_v22 = vmul.f32 %v1636_v19, %v3466_v62  ;;  %v1130_v42 = vmul.f32 %v1636_v19, %v3467_v17  ;;  %v1352_v15 = vadd.f32 %v2671_v50, %v1236_v34  ;;  %v1353_v35 = vadd.f32 %v2673_v49, %v1237_v52 }
 0x1b4   : > { %v1240_v0 = vmul.f32 %v2667_v12, %v1123_v38  ;;  %v1241_v11 = vmul.f32 %v2669_v13, %v1124_v55  ;;  %v1358_v40 = vadd.f32 %v2671_v50, %v1242_v47  ;;  %v1359_v59 = vadd.f32 %v2673_v49, %v1243_v33  ;;  %v1640_v18 = vpop.eup %1639 }
 0x1b5   : > { %v1246_v61 = vmul.f32 %v2667_v12, %v1129_v22  ;;  %v1247_v9 = vmul.f32 %v2669_v13, %v1130_v42  ;;  %1450 = vst [vmem:[%s2684_s20 + $0x290] sm:$0xff] %v1352_v15  ;;  %1451 = vst.msk [vmem:[%s2684_s20 + $0x298] sm:$0xff] %vm251_vm0, %v1353_v35  ;;  %v1127_v26 = vmul.f32 %v1638_v41, %v3468_v43  ;;  %v1642_v16 = vpop.eup %1641 }
 0x1b6   : > { %v1356_v58 = vadd.f32 %v2671_v50, %v1240_v0  ;;  %v1357_v8 = vadd.f32 %v2673_v49, %v1241_v11  ;;  %1456 = vst [vmem:[%s2684_s20 + $0x2c0] sm:$0xff] %v1358_v40  ;;  %1457 = vst.msk [vmem:[%s2684_s20 + $0x2c8] sm:$0xff] %vm251_vm0, %v1359_v59  ;;  %v1128_v7 = vmul.f32 %v1638_v41, %v3469_v36 }
 0x1b7   : > { %v1362_v60 = vadd.f32 %v2671_v50, %v1246_v61  ;;  %v1363_v14 = vadd.f32 %v2673_v49, %v1247_v9  ;;  %v1133_v53 = vmul.f32 %v1640_v18, %v3470_v23  ;;  %v1134_v63 = vmul.f32 %v1640_v18, %v3471_v30 }
 0x1b8   : > { %1454 = vst [vmem:[%s2684_s20 + $0x2b0] sm:$0xff] %v1356_v58  ;;  %1455 = vst.msk [vmem:[%s2684_s20 + $0x2b8] sm:$0xff] %vm251_vm0, %v1357_v8  ;;  %v1244_v2 = vmul.f32 %v2667_v12, %v1127_v26  ;;  %v1245_v57 = vmul.f32 %v2669_v13, %v1128_v7  ;;  %v1131_v21 = vmul.f32 %v1642_v16, %v3472_v20 }
 0x1b9   : > { %1460 = vst [vmem:[%s2684_s20 + $0x2e0] sm:$0xff] %v1362_v60  ;;  %1461 = vst.msk [vmem:[%s2684_s20 + $0x2e8] sm:$0xff] %vm251_vm0, %v1363_v14  ;;  %v1132_v4 = vmul.f32 %v1642_v16, %v3473_v39  ;;  %v1250_v24 = vmul.f32 %v2667_v12, %v1133_v53  ;;  %v1251_v27 = vmul.f32 %v2669_v13, %v1134_v63 }
 0x1ba   : > { %v1360_v46 = vadd.f32 %v2671_v50, %v1244_v2  ;;  %v1361_v10 = vadd.f32 %v2673_v49, %v1245_v57  ;;  %v1248_v44 = vmul.f32 %v2667_v12, %v1131_v21 }
 0x1bb   : > { %v1249_v45 = vmul.f32 %v2669_v13, %v1132_v4  ;;  %v1366_v6 = vadd.f32 %v2671_v50, %v1250_v24  ;;  %v1367_v31 = vadd.f32 %v2673_v49, %v1251_v27 }
 0x1bc   : > { %1458 = vst [vmem:[%s2684_s20 + $0x2d0] sm:$0xff] %v1360_v46  ;;  %1459 = vst.msk [vmem:[%s2684_s20 + $0x2d8] sm:$0xff] %vm251_vm0, %v1361_v10  ;;  %v1364_v51 = vadd.f32 %v2671_v50, %v1248_v44 }
 0x1bd   : > { %v1365_v56 = vadd.f32 %v2673_v49, %v1249_v45  ;;  %1464 = vst [vmem:[%s2684_s20 + $0x300] sm:$0xff] %v1366_v6  ;;  %1465 = vst.msk [vmem:[%s2684_s20 + $0x308] sm:$0xff] %vm251_vm0, %v1367_v31 }
 0x1be   : > { %1462 = vst [vmem:[%s2684_s20 + $0x2f0] sm:$0xff] %v1364_v51 }
 0x1bf   : > { %1463 = vst.msk [vmem:[%s2684_s20 + $0x2f8] sm:$0xff] %vm251_vm0, %v1365_v56 }
 0x1c0 PF: > { %s12_s9 = sadd.s32 1, %s1649_s9  }
 0x1c1   : > { %p9_p4 = scmp.ge.s32.totalorder %s12_s9, 4  }
 0x1c3   :  { %11 = sbr.rel (!%p9_p4) target bundleno = 1 (0x1), region = 58 }

</bundles_post_ra>
